<compile_context>
chip_gen: v7x
topology: tpu7x:2x2x1
jax: 0.10.0
libtpu: 0.0.40
codegen_flags: <defaults>
</compile_context>

<pallas_src>
import jax
import jax.numpy as jnp
from jax import lax
from jax.experimental import pallas as pl
from jax.experimental.pallas import tpu as pltpu


def _vmem_capacity_bytes() -> int:
    try:
        return int(pltpu.get_tpu_info().vmem_capacity_bytes)
    except Exception:
        return 64 * 1024 * 1024          # conservative fallback (v7x per-TC)


def _make_mha_kernel(num_heads, head_dim, block_b, has_mask, cdt):
    """Builds the kernel body; shapes / head count are trace-time constants."""

    def kernel(*refs):
        if has_mask:
            (x_ref, wq_ref, wk_ref, wv_ref, wp_ref, bp_ref, mask_ref,
             o_ref, q_scr, k_scr, v_scr, o_scr) = refs
        else:
            (x_ref, wq_ref, wk_ref, wv_ref, wp_ref, bp_ref,
             o_ref, q_scr, k_scr, v_scr, o_scr) = refs
            mask_ref = None

        bias = bp_ref[...].astype(jnp.float32)                    # (1, C)
        # Exact reciprocal when computing in f32; EUP approx otherwise.
        approx = cdt != jnp.float32
        contract_last = (((1,), (1,)), ((), ()))                  # q @ k^T style

        # Shared mask (batch dim 1 within this block): load/cast once.
        shared_mask = None
        if mask_ref is not None and mask_ref.shape[0] == 1:
            shared_mask = mask_ref[0].astype(jnp.float32)         # (Mq, N)

        for bi in range(block_b):
            x_b = x_ref[bi]                                       # (N, C)

            # Grouped Q/K/V projections over all heads: (N, C) x (C, C) on
            # the MXU, f32 accumulate into VMEM scratch.  The 1/sqrt(D)
            # scale is already folded into wq.
            q_scr[...] = jnp.dot(x_b, wq_ref[...],
                                 preferred_element_type=jnp.float32)
            k_scr[...] = jnp.dot(x_b, wk_ref[...],
                                 preferred_element_type=jnp.float32)
            v_scr[...] = jnp.dot(x_b, wv_ref[...],
                                 preferred_element_type=jnp.float32)

            if mask_ref is None:
                mask = None
            elif shared_mask is not None:
                mask = shared_mask
            else:
                mask = mask_ref[bi].astype(jnp.float32)           # (Mq, N)

            for h in range(num_heads):
                lo, hi = h * head_dim, (h + 1) * head_dim
                q_h = q_scr[:, lo:hi].astype(cdt)                 # (N, D)
                k_h = k_scr[:, lo:hi].astype(cdt)                 # (N, D)
                v_h = v_scr[:, lo:hi].astype(cdt)                 # (N, D)

                # Scores: contract D of q and k directly (no materialised k.T).
                s = lax.dot_general(q_h, k_h, contract_last,
                                    preferred_element_type=jnp.float32)
                if mask is not None:
                    s = s + mask           # broadcasts over the query dim

                # Softmax (note: a fully -inf masked row yields NaN, matching
                # the pure-JAX reference semantics).
                m = jnp.max(s, axis=-1, keepdims=True)
                p = jnp.exp(s - m)
                l = jnp.sum(p, axis=-1, keepdims=True)

                o_h = jnp.dot(p.astype(cdt), v_h,
                              preferred_element_type=jnp.float32)  # (N, D)
                o_h = o_h * pl.reciprocal(l, approx=approx)
                o_scr[:, lo:hi] = o_h.astype(o_scr.dtype)

            # Grouped output projection: one (N, C) x (C, C) matmul + bias,
            # dense lane store of the full (N, C) tile.
            out = jnp.dot(o_scr[...], wp_ref[...],
                          preferred_element_type=jnp.float32) + bias
            o_ref[bi] = out.astype(o_ref.dtype)

    return kernel


def mha1d_forward(x, wqkv, wproj, bproj, *, num_heads, attn_mask=None,
                  block_b=None, vmem_limit_bytes=None, mxu_dtype=None):
    """Pallas implementation of MultiHeadAttention1d.forward (eval mode).

    x:     (B, N, C)
    wqkv:  (3C, C)  PyTorch nn.Linear (out, in) layout; qkv_bias=False
    wproj: (C, C),  bproj: (C,)
    attn_mask: None, additive float (B|1, 1, 1|N, N), or bool (True = attend).
    mxu_dtype: optionally cast MXU operands (x / weights), e.g. jnp.bfloat16
        for ~4x MXU throughput on v6e/v7x; accumulation stays f32.
    """
    B, N, C = x.shape
    assert C % num_heads == 0, "dim must be divisible by num_heads"
    D = C // num_heads
    scale = D ** -0.5
    out_dtype = x.dtype

    cdt = jnp.dtype(mxu_dtype) if mxu_dtype is not None else x.dtype
    if x.dtype != cdt:
        x = x.astype(cdt)

    # Pre-arrange weights ONCE: (in, out) layout so the kernel never takes a
    # transpose; fold the softmax scale into Wq.
    wq_t = (wqkv[:C].T.astype(jnp.float32) * scale).astype(cdt)   # (C, C)
    wk_t = wqkv[C:2 * C].T.astype(cdt)                            # (C, C)
    wv_t = wqkv[2 * C:].T.astype(cdt)                             # (C, C)
    wp_t = wproj.T.astype(cdt)                                    # (C, C)
    bproj2d = bproj.reshape(1, C).astype(jnp.float32)

    # Mask: keep the native (possibly key-only) shape -- never broadcast to
    # (.., N, N) in HBM.  Bool masks follow SDPA semantics (True = attend).
    mask = None
    if attn_mask is not None:
        m = attn_mask
        if m.dtype == jnp.bool_:
            m = jnp.where(m, 0.0, -jnp.inf)
        m = m.astype(jnp.float32)
        assert m.ndim == 4 and m.shape[1] == 1 and m.shape[-1] == N
        assert m.shape[0] in (1, B) and m.shape[2] in (1, N)
        mask = m.reshape(m.shape[0], m.shape[2], N)               # (B|1, Mq, N)

    # ---- VMEM-aware tiling -------------------------------------------------
    vmem_cap = _vmem_capacity_bytes()
    if vmem_limit_bytes is None:
        # 96 MiB on 128-MiB parts (v5e/v6e); 48 MiB on 64-MiB parts (v7x).
        vmem_limit_bytes = (96 << 20) if vmem_cap >= (100 << 20) else (48 << 20)

    if block_b is None:
        xi = jnp.dtype(cdt).itemsize
        budget = int(0.8 * vmem_limit_bytes)
        fixed = 4 * C * C * xi + 4 * C                # weights + bias (1-buffered)
        fixed += 3 * N * C * 4 + N * C * xi           # Q/K/V (f32) + O scratch
        fixed += 2 * N * N * 4                        # live f32 (N, N) s and p
        per_b = 2 * 2 * N * C * xi                    # x + out blocks, 2-buffered
        if mask is not None:
            mbytes = mask.shape[1] * N * 4
            if mask.shape[0] == 1:
                fixed += mbytes                       # shared mask, 1-buffered
            else:
                per_b += 2 * mbytes                   # per-batch mask, 2-buffered
        min_steps = 2 if B >= 2 else 1                # keep both v7x TCs busy
        block_b = 1
        for d in range(1, min(B, 4) + 1):
            if B % d != 0 or B // d < min_steps:
                continue
            if fixed + d * per_b <= budget:
                block_b = d
    assert B % block_b == 0
    grid = (B // block_b,)

    one_buf = pl.Buffered(1)       # constant-index inputs: no double buffering
    in_specs = [
        pl.BlockSpec((block_b, N, C), lambda b: (b, 0, 0)),                  # x
        pl.BlockSpec((C, C), lambda b: (0, 0), pipeline_mode=one_buf),       # wq
        pl.BlockSpec((C, C), lambda b: (0, 0), pipeline_mode=one_buf),       # wk
        pl.BlockSpec((C, C), lambda b: (0, 0), pipeline_mode=one_buf),       # wv
        pl.BlockSpec((C, C), lambda b: (0, 0), pipeline_mode=one_buf),       # wproj
        pl.BlockSpec((1, C), lambda b: (0, 0), pipeline_mode=one_buf),       # bias
    ]
    args = [x, wq_t, wk_t, wv_t, wp_t, bproj2d]

    if mask is not None:
        mq = mask.shape[1]
        if mask.shape[0] == B:
            in_specs.append(pl.BlockSpec((block_b, mq, N), lambda b: (b, 0, 0)))
        else:   # shared mask: single constant block, single-buffered
            in_specs.append(pl.BlockSpec((1, mq, N), lambda b: (0, 0, 0),
                                         pipeline_mode=one_buf))
        args.append(mask)

    kernel = _make_mha_kernel(num_heads, D, block_b, mask is not None, cdt)

    return pl.pallas_call(
        kernel,
        out_shape=jax.ShapeDtypeStruct((B, N, C), out_dtype),
        grid=grid,
        in_specs=in_specs,
        out_specs=pl.BlockSpec((block_b, N, C), lambda b: (b, 0, 0)),
        scratch_shapes=[
            pltpu.VMEM((N, C), jnp.float32),   # Q (all heads, f32)
            pltpu.VMEM((N, C), jnp.float32),   # K
            pltpu.VMEM((N, C), jnp.float32),   # V
            pltpu.VMEM((N, C), cdt),           # attention output, pre-projection
        ],
        compiler_params=pltpu.CompilerParams(
            dimension_semantics=("parallel",),
            vmem_limit_bytes=vmem_limit_bytes),
    )(*args)


def mha1d_reference(x, wqkv, wproj, bproj, *, num_heads, attn_mask=None):
    """Plain-JAX reference mirroring the PyTorch module (eval mode)."""
    B, N, C = x.shape
    D = C // num_heads
    qkv = (x @ wqkv.T).reshape(B, N, 3, num_heads, D).transpose(2, 0, 3, 1, 4)
    q, k, v = qkv[0], qkv[1], qkv[2]
    s = jnp.einsum('bhqd,bhkd->bhqk', q, k) * (D ** -0.5)
    if attn_mask is not None:
        if attn_mask.dtype == jnp.bool_:
            s = jnp.where(attn_mask, s, -jnp.inf)
        else:
            s = s + attn_mask
    p = jax.nn.softmax(s, axis=-1)
    o = jnp.einsum('bhqk,bhkd->bhqd', p, v)
    o = o.transpose(0, 2, 1, 3).reshape(B, N, C)
    return o @ wproj.T + bproj


if __name__ == "__main__":
    # Small shapes: B=2, tokens N=8, dim C=32, num_heads=8 -> head_dim=4.
    B, N, C, H = 2, 8, 32, 8

    key = jax.random.PRNGKey(0)
    kx, kqkv, kproj, kb, km = jax.random.split(key, 5)

    x = jax.random.normal(kx, (B, N, C), dtype=jnp.float32)
    # Deterministic synthetic parameters (qkv_bias=False, proj_bias=True).
    wqkv = jax.random.normal(kqkv, (3 * C, C), dtype=jnp.float32) * 0.05
    wproj = jax.random.normal(kproj, (C, C), dtype=jnp.float32) * 0.05
    bproj = jax.random.normal(kb, (C,), dtype=jnp.float32) * 0.05

    TOL = 2e-3

    # 1) no mask: specialised path, no mask stream at all.
    out = jax.block_until_ready(mha1d_forward(x, wqkv, wproj, bproj, num_heads=H))
    ref = mha1d_reference(x, wqkv, wproj, bproj, num_heads=H)
    assert out.shape == (B, N, C)
    err = jnp.max(jnp.abs(out - ref))
    assert err < TOL, f"no-mask max err {err}"

    # 2) additive float mask, per batch element: (B, 1, 1, N) -- kept key-only
    #    (lane-dense), broadcast over the query dim inside the kernel.
    fmask = jax.random.normal(km, (B, 1, 1, N), dtype=jnp.float32) * 0.5
    out = jax.block_until_ready(
        mha1d_forward(x, wqkv, wproj, bproj, num_heads=H, attn_mask=fmask))
    ref = mha1d_reference(x, wqkv, wproj, bproj, num_heads=H, attn_mask=fmask)
    err = jnp.max(jnp.abs(out - ref))
    assert err < TOL, f"float-mask max err {err}"

    # 3) shared boolean mask (1, 1, N, N): last two keys masked out everywhere.
    bmask = jnp.ones((1, 1, N, N), dtype=jnp.bool_).at[..., N - 2:].set(False)
    out = jax.block_until_ready(
        mha1d_forward(x, wqkv, wproj, bproj, num_heads=H, attn_mask=bmask))
    ref = mha1d_reference(x, wqkv, wproj, bproj, num_heads=H, attn_mask=bmask)
    err = jnp.max(jnp.abs(out - ref))
    assert err < TOL, f"bool-mask max err {err}"

    print("KERNEL_OK")
</pallas_src>

<mosaic_0001>
module attributes {stable_mosaic.version = 11 : i64} {
  func.func @kernel(%arg0: i32, %arg1: memref<1x8x32xf32, #tpu.memory_space<vmem>>, %arg2: memref<32x32xf32, #tpu.memory_space<vmem>>, %arg3: memref<32x32xf32, #tpu.memory_space<vmem>>, %arg4: memref<32x32xf32, #tpu.memory_space<vmem>>, %arg5: memref<32x32xf32, #tpu.memory_space<vmem>>, %arg6: memref<1x32xf32, #tpu.memory_space<vmem>>, %arg7: memref<1x8x32xf32, #tpu.memory_space<vmem>>, %arg8: memref<8x32xf32, #tpu.memory_space<vmem>>, %arg9: memref<8x32xf32, #tpu.memory_space<vmem>>, %arg10: memref<8x32xf32, #tpu.memory_space<vmem>>, %arg11: memref<8x32xf32, #tpu.memory_space<vmem>>) attributes {dimension_semantics = [#tpu.dimension_semantics<parallel>], iteration_bounds = array<i64: 2>, scalar_prefetch = 0 : i64, scratch_operands = 4 : i64, tpu.core_type = #tpu.core_type<tc>, window_params = [{transform_indices = @transform_0, window_bounds = array<i64: 1, 8, 32>}, {pipeline_mode = #tpu.pipeline_mode<synchronous>, transform_indices = @transform_1, window_bounds = array<i64: 32, 32>}, {pipeline_mode = #tpu.pipeline_mode<synchronous>, transform_indices = @transform_2, window_bounds = array<i64: 32, 32>}, {pipeline_mode = #tpu.pipeline_mode<synchronous>, transform_indices = @transform_3, window_bounds = array<i64: 32, 32>}, {pipeline_mode = #tpu.pipeline_mode<synchronous>, transform_indices = @transform_4, window_bounds = array<i64: 32, 32>}, {pipeline_mode = #tpu.pipeline_mode<synchronous>, transform_indices = @transform_5, window_bounds = array<i64: 1, 32>}, {transform_indices = @transform_6, window_bounds = array<i64: 1, 8, 32>}]} {
    %c0 = arith.constant 0 : index
    %c0_0 = arith.constant 0 : index
    %0 = vector.load %arg6[%c0, %c0_0] : memref<1x32xf32, #tpu.memory_space<vmem>>, vector<1x32xf32>
    %c0_1 = arith.constant 0 : index
    %c0_2 = arith.constant 0 : index
    %c0_3 = arith.constant 0 : index
    %1 = vector.load %arg1[%c0_1, %c0_2, %c0_3] : memref<1x8x32xf32, #tpu.memory_space<vmem>>, vector<1x8x32xf32>
    %2 = vector.shape_cast %1 : vector<1x8x32xf32> to vector<8x32xf32>
    %c0_4 = arith.constant 0 : index
    %c0_5 = arith.constant 0 : index
    %3 = vector.load %arg2[%c0_4, %c0_5] : memref<32x32xf32, #tpu.memory_space<vmem>>, vector<32x32xf32>
    %cst = arith.constant dense<0.000000e+00> : vector<8x32xf32>
    %4 = tpu.matmul %2, %3, %cst {dimension_numbers = #tpu.dot_dimension_numbers<[1], [0], [0], [1], [0, 0, 1, 1], [], []>} : vector<8x32xf32>, vector<32x32xf32>, vector<8x32xf32> -> vector<8x32xf32>
    %c0_6 = arith.constant 0 : index
    %c0_7 = arith.constant 0 : index
    %5 = vector.load %arg8[%c0_6, %c0_7] : memref<8x32xf32, #tpu.memory_space<vmem>>, vector<8x32xf32>
    tpu.vector_store %arg8[%c0_6, %c0_7], %4 {strides = array<i32>} : memref<8x32xf32, #tpu.memory_space<vmem>>, vector<8x32xf32>,
    %c0_8 = arith.constant 0 : index
    %c0_9 = arith.constant 0 : index
    %6 = vector.load %arg3[%c0_8, %c0_9] : memref<32x32xf32, #tpu.memory_space<vmem>>, vector<32x32xf32>
    %cst_10 = arith.constant dense<0.000000e+00> : vector<8x32xf32>
    %7 = tpu.matmul %2, %6, %cst_10 {dimension_numbers = #tpu.dot_dimension_numbers<[1], [0], [0], [1], [0, 0, 1, 1], [], []>} : vector<8x32xf32>, vector<32x32xf32>, vector<8x32xf32> -> vector<8x32xf32>
    %c0_11 = arith.constant 0 : index
    %c0_12 = arith.constant 0 : index
    %8 = vector.load %arg9[%c0_11, %c0_12] : memref<8x32xf32, #tpu.memory_space<vmem>>, vector<8x32xf32>
    tpu.vector_store %arg9[%c0_11, %c0_12], %7 {strides = array<i32>} : memref<8x32xf32, #tpu.memory_space<vmem>>, vector<8x32xf32>,
    %c0_13 = arith.constant 0 : index
    %c0_14 = arith.constant 0 : index
    %9 = vector.load %arg4[%c0_13, %c0_14] : memref<32x32xf32, #tpu.memory_space<vmem>>, vector<32x32xf32>
    %cst_15 = arith.constant dense<0.000000e+00> : vector<8x32xf32>
    %10 = tpu.matmul %2, %9, %cst_15 {dimension_numbers = #tpu.dot_dimension_numbers<[1], [0], [0], [1], [0, 0, 1, 1], [], []>} : vector<8x32xf32>, vector<32x32xf32>, vector<8x32xf32> -> vector<8x32xf32>
    %c0_16 = arith.constant 0 : index
    %c0_17 = arith.constant 0 : index
    %11 = vector.load %arg10[%c0_16, %c0_17] : memref<8x32xf32, #tpu.memory_space<vmem>>, vector<8x32xf32>
    tpu.vector_store %arg10[%c0_16, %c0_17], %10 {strides = array<i32>} : memref<8x32xf32, #tpu.memory_space<vmem>>, vector<8x32xf32>,
    %c0_18 = arith.constant 0 : index
    %c0_19 = arith.constant 0 : index
    %12 = vector.load %arg8[%c0_18, %c0_19] : memref<8x32xf32, #tpu.memory_space<vmem>>, vector<8x4xf32>
    %c0_20 = arith.constant 0 : index
    %c0_21 = arith.constant 0 : index
    %13 = vector.load %arg9[%c0_20, %c0_21] : memref<8x32xf32, #tpu.memory_space<vmem>>, vector<8x4xf32>
    %c0_22 = arith.constant 0 : index
    %c0_23 = arith.constant 0 : index
    %14 = vector.load %arg10[%c0_22, %c0_23] : memref<8x32xf32, #tpu.memory_space<vmem>>, vector<8x4xf32>
    %cst_24 = arith.constant dense<0.000000e+00> : vector<8x8xf32>
    %15 = tpu.matmul %12, %13, %cst_24 {dimension_numbers = #tpu.dot_dimension_numbers<[1], [1], [0], [0], [0, 0, 1, 0], [], []>} : vector<8x4xf32>, vector<8x4xf32>, vector<8x8xf32> -> vector<8x8xf32>
    %cst_25 = arith.constant dense<0xFF800000> : vector<8xf32>
    %16 = vector.multi_reduction <maximumf>, %15, %cst_25 [1] : vector<8x8xf32> to vector<8xf32>
    %17 = vector.shape_cast %16 : vector<8xf32> to vector<8x1xf32>
    %18 = vector.broadcast %17 : vector<8x1xf32> to vector<8x8xf32>
    %19 = arith.subf %15, %18 : vector<8x8xf32>
    %20 = math.exp %19 : vector<8x8xf32>
    %cst_26 = arith.constant dense<0.000000e+00> : vector<8xf32>
    %21 = vector.multi_reduction <add>, %20, %cst_26 [1] : vector<8x8xf32> to vector<8xf32>
    %22 = vector.shape_cast %21 : vector<8xf32> to vector<8x1xf32>
    %cst_27 = arith.constant dense<0.000000e+00> : vector<8x4xf32>
    %23 = tpu.matmul %20, %14, %cst_27 {dimension_numbers = #tpu.dot_dimension_numbers<[1], [0], [0], [1], [0, 0, 1, 1], [], []>} : vector<8x8xf32>, vector<8x4xf32>, vector<8x4xf32> -> vector<8x4xf32>
    %24 = tpu.reciprocal %22 : vector<8x1xf32> -> vector<8x1xf32>
    %25 = vector.broadcast %24 : vector<8x1xf32> to vector<8x4xf32>
    %26 = arith.mulf %23, %25 : vector<8x4xf32>
    %c0_28 = arith.constant 0 : index
    %c0_29 = arith.constant 0 : index
    %27 = vector.load %arg11[%c0_28, %c0_29] : memref<8x32xf32, #tpu.memory_space<vmem>>, vector<8x4xf32>
    tpu.vector_store %arg11[%c0_28, %c0_29], %26 {strides = array<i32>} : memref<8x32xf32, #tpu.memory_space<vmem>>, vector<8x4xf32>,
    %c0_30 = arith.constant 0 : index
    %c4 = arith.constant 4 : index
    %28 = vector.load %arg8[%c0_30, %c4] : memref<8x32xf32, #tpu.memory_space<vmem>>, vector<8x4xf32>
    %c0_31 = arith.constant 0 : index
    %c4_32 = arith.constant 4 : index
    %29 = vector.load %arg9[%c0_31, %c4_32] : memref<8x32xf32, #tpu.memory_space<vmem>>, vector<8x4xf32>
    %c0_33 = arith.constant 0 : index
    %c4_34 = arith.constant 4 : index
    %30 = vector.load %arg10[%c0_33, %c4_34] : memref<8x32xf32, #tpu.memory_space<vmem>>, vector<8x4xf32>
    %cst_35 = arith.constant dense<0.000000e+00> : vector<8x8xf32>
    %31 = tpu.matmul %28, %29, %cst_35 {dimension_numbers = #tpu.dot_dimension_numbers<[1], [1], [0], [0], [0, 0, 1, 0], [], []>} : vector<8x4xf32>, vector<8x4xf32>, vector<8x8xf32> -> vector<8x8xf32>
    %cst_36 = arith.constant dense<0xFF800000> : vector<8xf32>
    %32 = vector.multi_reduction <maximumf>, %31, %cst_36 [1] : vector<8x8xf32> to vector<8xf32>
    %33 = vector.shape_cast %32 : vector<8xf32> to vector<8x1xf32>
    %34 = vector.broadcast %33 : vector<8x1xf32> to vector<8x8xf32>
    %35 = arith.subf %31, %34 : vector<8x8xf32>
    %36 = math.exp %35 : vector<8x8xf32>
    %cst_37 = arith.constant dense<0.000000e+00> : vector<8xf32>
    %37 = vector.multi_reduction <add>, %36, %cst_37 [1] : vector<8x8xf32> to vector<8xf32>
    %38 = vector.shape_cast %37 : vector<8xf32> to vector<8x1xf32>
    %cst_38 = arith.constant dense<0.000000e+00> : vector<8x4xf32>
    %39 = tpu.matmul %36, %30, %cst_38 {dimension_numbers = #tpu.dot_dimension_numbers<[1], [0], [0], [1], [0, 0, 1, 1], [], []>} : vector<8x8xf32>, vector<8x4xf32>, vector<8x4xf32> -> vector<8x4xf32>
    %40 = tpu.reciprocal %38 : vector<8x1xf32> -> vector<8x1xf32>
    %41 = vector.broadcast %40 : vector<8x1xf32> to vector<8x4xf32>
    %42 = arith.mulf %39, %41 : vector<8x4xf32>
    %c0_39 = arith.constant 0 : index
    %c4_40 = arith.constant 4 : index
    %43 = vector.load %arg11[%c0_39, %c4_40] : memref<8x32xf32, #tpu.memory_space<vmem>>, vector<8x4xf32>
    tpu.vector_store %arg11[%c0_39, %c4_40], %42 {strides = array<i32>} : memref<8x32xf32, #tpu.memory_space<vmem>>, vector<8x4xf32>,
    %c0_41 = arith.constant 0 : index
    %c8 = arith.constant 8 : index
    %44 = vector.load %arg8[%c0_41, %c8] : memref<8x32xf32, #tpu.memory_space<vmem>>, vector<8x4xf32>
    %c0_42 = arith.constant 0 : index
    %c8_43 = arith.constant 8 : index
    %45 = vector.load %arg9[%c0_42, %c8_43] : memref<8x32xf32, #tpu.memory_space<vmem>>, vector<8x4xf32>
    %c0_44 = arith.constant 0 : index
    %c8_45 = arith.constant 8 : index
    %46 = vector.load %arg10[%c0_44, %c8_45] : memref<8x32xf32, #tpu.memory_space<vmem>>, vector<8x4xf32>
    %cst_46 = arith.constant dense<0.000000e+00> : vector<8x8xf32>
    %47 = tpu.matmul %44, %45, %cst_46 {dimension_numbers = #tpu.dot_dimension_numbers<[1], [1], [0], [0], [0, 0, 1, 0], [], []>} : vector<8x4xf32>, vector<8x4xf32>, vector<8x8xf32> -> vector<8x8xf32>
    %cst_47 = arith.constant dense<0xFF800000> : vector<8xf32>
    %48 = vector.multi_reduction <maximumf>, %47, %cst_47 [1] : vector<8x8xf32> to vector<8xf32>
    %49 = vector.shape_cast %48 : vector<8xf32> to vector<8x1xf32>
    %50 = vector.broadcast %49 : vector<8x1xf32> to vector<8x8xf32>
    %51 = arith.subf %47, %50 : vector<8x8xf32>
    %52 = math.exp %51 : vector<8x8xf32>
    %cst_48 = arith.constant dense<0.000000e+00> : vector<8xf32>
    %53 = vector.multi_reduction <add>, %52, %cst_48 [1] : vector<8x8xf32> to vector<8xf32>
    %54 = vector.shape_cast %53 : vector<8xf32> to vector<8x1xf32>
    %cst_49 = arith.constant dense<0.000000e+00> : vector<8x4xf32>
    %55 = tpu.matmul %52, %46, %cst_49 {dimension_numbers = #tpu.dot_dimension_numbers<[1], [0], [0], [1], [0, 0, 1, 1], [], []>} : vector<8x8xf32>, vector<8x4xf32>, vector<8x4xf32> -> vector<8x4xf32>
    %56 = tpu.reciprocal %54 : vector<8x1xf32> -> vector<8x1xf32>
    %57 = vector.broadcast %56 : vector<8x1xf32> to vector<8x4xf32>
    %58 = arith.mulf %55, %57 : vector<8x4xf32>
    %c0_50 = arith.constant 0 : index
    %c8_51 = arith.constant 8 : index
    %59 = vector.load %arg11[%c0_50, %c8_51] : memref<8x32xf32, #tpu.memory_space<vmem>>, vector<8x4xf32>
    tpu.vector_store %arg11[%c0_50, %c8_51], %58 {strides = array<i32>} : memref<8x32xf32, #tpu.memory_space<vmem>>, vector<8x4xf32>,
    %c0_52 = arith.constant 0 : index
    %c12 = arith.constant 12 : index
    %60 = vector.load %arg8[%c0_52, %c12] : memref<8x32xf32, #tpu.memory_space<vmem>>, vector<8x4xf32>
    %c0_53 = arith.constant 0 : index
    %c12_54 = arith.constant 12 : index
    %61 = vector.load %arg9[%c0_53, %c12_54] : memref<8x32xf32, #tpu.memory_space<vmem>>, vector<8x4xf32>
    %c0_55 = arith.constant 0 : index
    %c12_56 = arith.constant 12 : index
    %62 = vector.load %arg10[%c0_55, %c12_56] : memref<8x32xf32, #tpu.memory_space<vmem>>, vector<8x4xf32>
    %cst_57 = arith.constant dense<0.000000e+00> : vector<8x8xf32>
    %63 = tpu.matmul %60, %61, %cst_57 {dimension_numbers = #tpu.dot_dimension_numbers<[1], [1], [0], [0], [0, 0, 1, 0], [], []>} : vector<8x4xf32>, vector<8x4xf32>, vector<8x8xf32> -> vector<8x8xf32>
    %cst_58 = arith.constant dense<0xFF800000> : vector<8xf32>
    %64 = vector.multi_reduction <maximumf>, %63, %cst_58 [1] : vector<8x8xf32> to vector<8xf32>
    %65 = vector.shape_cast %64 : vector<8xf32> to vector<8x1xf32>
    %66 = vector.broadcast %65 : vector<8x1xf32> to vector<8x8xf32>
    %67 = arith.subf %63, %66 : vector<8x8xf32>
    %68 = math.exp %67 : vector<8x8xf32>
    %cst_59 = arith.constant dense<0.000000e+00> : vector<8xf32>
    %69 = vector.multi_reduction <add>, %68, %cst_59 [1] : vector<8x8xf32> to vector<8xf32>
    %70 = vector.shape_cast %69 : vector<8xf32> to vector<8x1xf32>
    %cst_60 = arith.constant dense<0.000000e+00> : vector<8x4xf32>
    %71 = tpu.matmul %68, %62, %cst_60 {dimension_numbers = #tpu.dot_dimension_numbers<[1], [0], [0], [1], [0, 0, 1, 1], [], []>} : vector<8x8xf32>, vector<8x4xf32>, vector<8x4xf32> -> vector<8x4xf32>
    %72 = tpu.reciprocal %70 : vector<8x1xf32> -> vector<8x1xf32>
    %73 = vector.broadcast %72 : vector<8x1xf32> to vector<8x4xf32>
    %74 = arith.mulf %71, %73 : vector<8x4xf32>
    %c0_61 = arith.constant 0 : index
    %c12_62 = arith.constant 12 : index
    %75 = vector.load %arg11[%c0_61, %c12_62] : memref<8x32xf32, #tpu.memory_space<vmem>>, vector<8x4xf32>
    tpu.vector_store %arg11[%c0_61, %c12_62], %74 {strides = array<i32>} : memref<8x32xf32, #tpu.memory_space<vmem>>, vector<8x4xf32>,
    %c0_63 = arith.constant 0 : index
    %c16 = arith.constant 16 : index
    %76 = vector.load %arg8[%c0_63, %c16] : memref<8x32xf32, #tpu.memory_space<vmem>>, vector<8x4xf32>
    %c0_64 = arith.constant 0 : index
    %c16_65 = arith.constant 16 : index
    %77 = vector.load %arg9[%c0_64, %c16_65] : memref<8x32xf32, #tpu.memory_space<vmem>>, vector<8x4xf32>
    %c0_66 = arith.constant 0 : index
    %c16_67 = arith.constant 16 : index
    %78 = vector.load %arg10[%c0_66, %c16_67] : memref<8x32xf32, #tpu.memory_space<vmem>>, vector<8x4xf32>
    %cst_68 = arith.constant dense<0.000000e+00> : vector<8x8xf32>
    %79 = tpu.matmul %76, %77, %cst_68 {dimension_numbers = #tpu.dot_dimension_numbers<[1], [1], [0], [0], [0, 0, 1, 0], [], []>} : vector<8x4xf32>, vector<8x4xf32>, vector<8x8xf32> -> vector<8x8xf32>
    %cst_69 = arith.constant dense<0xFF800000> : vector<8xf32>
    %80 = vector.multi_reduction <maximumf>, %79, %cst_69 [1] : vector<8x8xf32> to vector<8xf32>
    %81 = vector.shape_cast %80 : vector<8xf32> to vector<8x1xf32>
    %82 = vector.broadcast %81 : vector<8x1xf32> to vector<8x8xf32>
    %83 = arith.subf %79, %82 : vector<8x8xf32>
    %84 = math.exp %83 : vector<8x8xf32>
    %cst_70 = arith.constant dense<0.000000e+00> : vector<8xf32>
    %85 = vector.multi_reduction <add>, %84, %cst_70 [1] : vector<8x8xf32> to vector<8xf32>
    %86 = vector.shape_cast %85 : vector<8xf32> to vector<8x1xf32>
    %cst_71 = arith.constant dense<0.000000e+00> : vector<8x4xf32>
    %87 = tpu.matmul %84, %78, %cst_71 {dimension_numbers = #tpu.dot_dimension_numbers<[1], [0], [0], [1], [0, 0, 1, 1], [], []>} : vector<8x8xf32>, vector<8x4xf32>, vector<8x4xf32> -> vector<8x4xf32>
    %88 = tpu.reciprocal %86 : vector<8x1xf32> -> vector<8x1xf32>
    %89 = vector.broadcast %88 : vector<8x1xf32> to vector<8x4xf32>
    %90 = arith.mulf %87, %89 : vector<8x4xf32>
    %c0_72 = arith.constant 0 : index
    %c16_73 = arith.constant 16 : index
    %91 = vector.load %arg11[%c0_72, %c16_73] : memref<8x32xf32, #tpu.memory_space<vmem>>, vector<8x4xf32>
    tpu.vector_store %arg11[%c0_72, %c16_73], %90 {strides = array<i32>} : memref<8x32xf32, #tpu.memory_space<vmem>>, vector<8x4xf32>,
    %c0_74 = arith.constant 0 : index
    %c20 = arith.constant 20 : index
    %92 = vector.load %arg8[%c0_74, %c20] : memref<8x32xf32, #tpu.memory_space<vmem>>, vector<8x4xf32>
    %c0_75 = arith.constant 0 : index
    %c20_76 = arith.constant 20 : index
    %93 = vector.load %arg9[%c0_75, %c20_76] : memref<8x32xf32, #tpu.memory_space<vmem>>, vector<8x4xf32>
    %c0_77 = arith.constant 0 : index
    %c20_78 = arith.constant 20 : index
    %94 = vector.load %arg10[%c0_77, %c20_78] : memref<8x32xf32, #tpu.memory_space<vmem>>, vector<8x4xf32>
    %cst_79 = arith.constant dense<0.000000e+00> : vector<8x8xf32>
    %95 = tpu.matmul %92, %93, %cst_79 {dimension_numbers = #tpu.dot_dimension_numbers<[1], [1], [0], [0], [0, 0, 1, 0], [], []>} : vector<8x4xf32>, vector<8x4xf32>, vector<8x8xf32> -> vector<8x8xf32>
    %cst_80 = arith.constant dense<0xFF800000> : vector<8xf32>
    %96 = vector.multi_reduction <maximumf>, %95, %cst_80 [1] : vector<8x8xf32> to vector<8xf32>
    %97 = vector.shape_cast %96 : vector<8xf32> to vector<8x1xf32>
    %98 = vector.broadcast %97 : vector<8x1xf32> to vector<8x8xf32>
    %99 = arith.subf %95, %98 : vector<8x8xf32>
    %100 = math.exp %99 : vector<8x8xf32>
    %cst_81 = arith.constant dense<0.000000e+00> : vector<8xf32>
    %101 = vector.multi_reduction <add>, %100, %cst_81 [1] : vector<8x8xf32> to vector<8xf32>
    %102 = vector.shape_cast %101 : vector<8xf32> to vector<8x1xf32>
    %cst_82 = arith.constant dense<0.000000e+00> : vector<8x4xf32>
    %103 = tpu.matmul %100, %94, %cst_82 {dimension_numbers = #tpu.dot_dimension_numbers<[1], [0], [0], [1], [0, 0, 1, 1], [], []>} : vector<8x8xf32>, vector<8x4xf32>, vector<8x4xf32> -> vector<8x4xf32>
    %104 = tpu.reciprocal %102 : vector<8x1xf32> -> vector<8x1xf32>
    %105 = vector.broadcast %104 : vector<8x1xf32> to vector<8x4xf32>
    %106 = arith.mulf %103, %105 : vector<8x4xf32>
    %c0_83 = arith.constant 0 : index
    %c20_84 = arith.constant 20 : index
    %107 = vector.load %arg11[%c0_83, %c20_84] : memref<8x32xf32, #tpu.memory_space<vmem>>, vector<8x4xf32>
    tpu.vector_store %arg11[%c0_83, %c20_84], %106 {strides = array<i32>} : memref<8x32xf32, #tpu.memory_space<vmem>>, vector<8x4xf32>,
    %c0_85 = arith.constant 0 : index
    %c24 = arith.constant 24 : index
    %108 = vector.load %arg8[%c0_85, %c24] : memref<8x32xf32, #tpu.memory_space<vmem>>, vector<8x4xf32>
    %c0_86 = arith.constant 0 : index
    %c24_87 = arith.constant 24 : index
    %109 = vector.load %arg9[%c0_86, %c24_87] : memref<8x32xf32, #tpu.memory_space<vmem>>, vector<8x4xf32>
    %c0_88 = arith.constant 0 : index
    %c24_89 = arith.constant 24 : index
    %110 = vector.load %arg10[%c0_88, %c24_89] : memref<8x32xf32, #tpu.memory_space<vmem>>, vector<8x4xf32>
    %cst_90 = arith.constant dense<0.000000e+00> : vector<8x8xf32>
    %111 = tpu.matmul %108, %109, %cst_90 {dimension_numbers = #tpu.dot_dimension_numbers<[1], [1], [0], [0], [0, 0, 1, 0], [], []>} : vector<8x4xf32>, vector<8x4xf32>, vector<8x8xf32> -> vector<8x8xf32>
    %cst_91 = arith.constant dense<0xFF800000> : vector<8xf32>
    %112 = vector.multi_reduction <maximumf>, %111, %cst_91 [1] : vector<8x8xf32> to vector<8xf32>
    %113 = vector.shape_cast %112 : vector<8xf32> to vector<8x1xf32>
    %114 = vector.broadcast %113 : vector<8x1xf32> to vector<8x8xf32>
    %115 = arith.subf %111, %114 : vector<8x8xf32>
    %116 = math.exp %115 : vector<8x8xf32>
    %cst_92 = arith.constant dense<0.000000e+00> : vector<8xf32>
    %117 = vector.multi_reduction <add>, %116, %cst_92 [1] : vector<8x8xf32> to vector<8xf32>
    %118 = vector.shape_cast %117 : vector<8xf32> to vector<8x1xf32>
    %cst_93 = arith.constant dense<0.000000e+00> : vector<8x4xf32>
    %119 = tpu.matmul %116, %110, %cst_93 {dimension_numbers = #tpu.dot_dimension_numbers<[1], [0], [0], [1], [0, 0, 1, 1], [], []>} : vector<8x8xf32>, vector<8x4xf32>, vector<8x4xf32> -> vector<8x4xf32>
    %120 = tpu.reciprocal %118 : vector<8x1xf32> -> vector<8x1xf32>
    %121 = vector.broadcast %120 : vector<8x1xf32> to vector<8x4xf32>
    %122 = arith.mulf %119, %121 : vector<8x4xf32>
    %c0_94 = arith.constant 0 : index
    %c24_95 = arith.constant 24 : index
    %123 = vector.load %arg11[%c0_94, %c24_95] : memref<8x32xf32, #tpu.memory_space<vmem>>, vector<8x4xf32>
    tpu.vector_store %arg11[%c0_94, %c24_95], %122 {strides = array<i32>} : memref<8x32xf32, #tpu.memory_space<vmem>>, vector<8x4xf32>,
    %c0_96 = arith.constant 0 : index
    %c28 = arith.constant 28 : index
    %124 = vector.load %arg8[%c0_96, %c28] : memref<8x32xf32, #tpu.memory_space<vmem>>, vector<8x4xf32>
    %c0_97 = arith.constant 0 : index
    %c28_98 = arith.constant 28 : index
    %125 = vector.load %arg9[%c0_97, %c28_98] : memref<8x32xf32, #tpu.memory_space<vmem>>, vector<8x4xf32>
    %c0_99 = arith.constant 0 : index
    %c28_100 = arith.constant 28 : index
    %126 = vector.load %arg10[%c0_99, %c28_100] : memref<8x32xf32, #tpu.memory_space<vmem>>, vector<8x4xf32>
    %cst_101 = arith.constant dense<0.000000e+00> : vector<8x8xf32>
    %127 = tpu.matmul %124, %125, %cst_101 {dimension_numbers = #tpu.dot_dimension_numbers<[1], [1], [0], [0], [0, 0, 1, 0], [], []>} : vector<8x4xf32>, vector<8x4xf32>, vector<8x8xf32> -> vector<8x8xf32>
    %cst_102 = arith.constant dense<0xFF800000> : vector<8xf32>
    %128 = vector.multi_reduction <maximumf>, %127, %cst_102 [1] : vector<8x8xf32> to vector<8xf32>
    %129 = vector.shape_cast %128 : vector<8xf32> to vector<8x1xf32>
    %130 = vector.broadcast %129 : vector<8x1xf32> to vector<8x8xf32>
    %131 = arith.subf %127, %130 : vector<8x8xf32>
    %132 = math.exp %131 : vector<8x8xf32>
    %cst_103 = arith.constant dense<0.000000e+00> : vector<8xf32>
    %133 = vector.multi_reduction <add>, %132, %cst_103 [1] : vector<8x8xf32> to vector<8xf32>
    %134 = vector.shape_cast %133 : vector<8xf32> to vector<8x1xf32>
    %cst_104 = arith.constant dense<0.000000e+00> : vector<8x4xf32>
    %135 = tpu.matmul %132, %126, %cst_104 {dimension_numbers = #tpu.dot_dimension_numbers<[1], [0], [0], [1], [0, 0, 1, 1], [], []>} : vector<8x8xf32>, vector<8x4xf32>, vector<8x4xf32> -> vector<8x4xf32>
    %136 = tpu.reciprocal %134 : vector<8x1xf32> -> vector<8x1xf32>
    %137 = vector.broadcast %136 : vector<8x1xf32> to vector<8x4xf32>
    %138 = arith.mulf %135, %137 : vector<8x4xf32>
    %c0_105 = arith.constant 0 : index
    %c28_106 = arith.constant 28 : index
    %139 = vector.load %arg11[%c0_105, %c28_106] : memref<8x32xf32, #tpu.memory_space<vmem>>, vector<8x4xf32>
    tpu.vector_store %arg11[%c0_105, %c28_106], %138 {strides = array<i32>} : memref<8x32xf32, #tpu.memory_space<vmem>>, vector<8x4xf32>,
    %c0_107 = arith.constant 0 : index
    %c0_108 = arith.constant 0 : index
    %140 = vector.load %arg11[%c0_107, %c0_108] : memref<8x32xf32, #tpu.memory_space<vmem>>, vector<8x32xf32>
    %c0_109 = arith.constant 0 : index
    %c0_110 = arith.constant 0 : index
    %141 = vector.load %arg5[%c0_109, %c0_110] : memref<32x32xf32, #tpu.memory_space<vmem>>, vector<32x32xf32>
    %cst_111 = arith.constant dense<0.000000e+00> : vector<8x32xf32>
    %142 = tpu.matmul %140, %141, %cst_111 {dimension_numbers = #tpu.dot_dimension_numbers<[1], [0], [0], [1], [0, 0, 1, 1], [], []>} : vector<8x32xf32>, vector<32x32xf32>, vector<8x32xf32> -> vector<8x32xf32>
    %143 = vector.broadcast %0 : vector<1x32xf32> to vector<8x32xf32>
    %144 = arith.addf %142, %143 : vector<8x32xf32>
    %c0_112 = arith.constant 0 : index
    %c0_113 = arith.constant 0 : index
    %c0_114 = arith.constant 0 : index
    %145 = vector.load %arg7[%c0_112, %c0_113, %c0_114] : memref<1x8x32xf32, #tpu.memory_space<vmem>>, vector<1x8x32xf32>
    %146 = vector.shape_cast %145 : vector<1x8x32xf32> to vector<8x32xf32>
    %147 = vector.shape_cast %144 : vector<8x32xf32> to vector<1x8x32xf32>
    tpu.vector_store %arg7[%c0_112, %c0_113, %c0_114], %147 {strides = array<i32>} : memref<1x8x32xf32, #tpu.memory_space<vmem>>, vector<1x8x32xf32>,
    return
  }
  func.func @transform_0(%arg0: i32) -> (i32, i32, i32) {
    %c0_i32 = arith.constant 0 : i32
    %c0_i32_0 = arith.constant 0 : i32
    %c0_i32_1 = arith.constant 0 : i32
    return %arg0, %c0_i32, %c0_i32_0 : i32, i32, i32
  }
  func.func @transform_1(%arg0: i32) -> (i32, i32) {
    %c0_i32 = arith.constant 0 : i32
    %c0_i32_0 = arith.constant 0 : i32
    %c0_i32_1 = arith.constant 0 : i32
    return %c0_i32, %c0_i32_0 : i32, i32
  }
  func.func @transform_2(%arg0: i32) -> (i32, i32) {
    %c0_i32 = arith.constant 0 : i32
    %c0_i32_0 = arith.constant 0 : i32
    %c0_i32_1 = arith.constant 0 : i32
    return %c0_i32, %c0_i32_0 : i32, i32
  }
  func.func @transform_3(%arg0: i32) -> (i32, i32) {
    %c0_i32 = arith.constant 0 : i32
    %c0_i32_0 = arith.constant 0 : i32
    %c0_i32_1 = arith.constant 0 : i32
    return %c0_i32, %c0_i32_0 : i32, i32
  }
  func.func @transform_4(%arg0: i32) -> (i32, i32) {
    %c0_i32 = arith.constant 0 : i32
    %c0_i32_0 = arith.constant 0 : i32
    %c0_i32_1 = arith.constant 0 : i32
    return %c0_i32, %c0_i32_0 : i32, i32
  }
  func.func @transform_5(%arg0: i32) -> (i32, i32) {
    %c0_i32 = arith.constant 0 : i32
    %c0_i32_0 = arith.constant 0 : i32
    %c0_i32_1 = arith.constant 0 : i32
    return %c0_i32, %c0_i32_0 : i32, i32
  }
  func.func @transform_6(%arg0: i32) -> (i32, i32, i32) {
    %c0_i32 = arith.constant 0 : i32
    %c0_i32_0 = arith.constant 0 : i32
    %c0_i32_1 = arith.constant 0 : i32
    return %arg0, %c0_i32, %c0_i32_0 : i32, i32, i32
  }
}

</mosaic_0001>

<bundles_post_ra>
// kernel: tpu_custom_call.1
= control target key start
LH: loop header
LB: loop body
LE: loop exit
PB: predicated region body
PF: predicated region fallthrough
CT: control target
= control target key end

     0   :  { %11 = vsyncpa [#allocation7], 0  ;;  %s3301_s0 = inlined_call_operand.hbm [shape: f32[2,8,32], index: 0, kind: input, shape index: {}]   ;;  %s3302_s1 = inlined_call_operand.hbm [shape: f32[32,32], index: 1, kind: input, shape index: {}]   ;;  %s3303_s2 = inlined_call_operand.hbm [shape: f32[32,32], index: 2, kind: input, shape index: {}]   ;;  %s3304_s3 = inlined_call_operand.hbm [shape: f32[32,32], index: 3, kind: input, shape index: {}]   ;;  %s3305_s4 = inlined_call_operand.hbm [shape: f32[32,32], index: 4, kind: input, shape index: {}]   ;;  %s3306_s5 = inlined_call_operand.vmem [shape: f32[1,32], index: 5, kind: input, shape index: {}]   ;;  %s3307_s6 = inlined_call_operand.hbm [shape: f32[2,8,32], index: 6, kind: output, shape index: {}]  }
   0x1   :  { %13 = vsyncpa [#allocation7 + $0x1], 0 }
   0x2   :  { %14 = vsyncpa [#allocation10], 0 }
   0x3   :  { %15 = vsyncpa [#allocation13], 0 }
   0x4   :  { %16 = vsyncpa [#allocation8], 0 }
   0x5   :  { %18 = vsyncpa [#allocation8 + $0x1], 0  ;;  %s2833_s21 = smov 0   ;;  %s2835_s22 = smov 0  }
   0x6   :  { %s2837_s23 = smov 0   ;;  %s2839_s24 = smov 0  }
   0x7 LB: > { %s2773_s25 = smov [#allocation9]   ;;  %s2854_s27 = sadd.s32 4294967295, %s2771_s24   ;;  %s2771_s24 = sphi %s2839_s24, %s3331_s24   ;;  %s2767_s23 = sphi %s2837_s23, %s3330_s23   ;;  %s2763_s22 = sphi %s2835_s22, %s3329_s22   ;;  %s2759_s21 = sphi %s2833_s21, %s3328_s21  }
   0x8   : > { %s198_s26 = sshll.u32 %s2773_s25, 4  ;;  %p2169_p0 = scmp.ge.s32.totalorder %s2771_s24, 1  ;;  %s2859_s26 = int_to_ptr.vmem [resolvable:$true] %s198_s26 }
   0x9   : > { %p3308_p1 = scmp.eq.s32.totalorder %s2854_s27, 0  ;;  %p186_p2 = scmp.lt.s32.totalorder %s2771_s24, 3 }
   0xa   : > { %s2774_s29 = smov [#allocation12]   ;;  %s2775_s8 = smov [#allocation11]  }
   0xb   : > { %p2861_p3 = pnand %p2169_p0, %p186_p2  ;;  %s224_s30 = sshll.u32 %s2774_s29, 4  ;;  %s2874_s30 = int_to_ptr.vmem [resolvable:$true] %s224_s30 }
   0xc   : > { %s211_s9 = sshll.u32 %s2775_s8, 4  ;;  %s2555_s12 = scalar_lea.hbm %s3302_s1, 512  ;;  %s2876_s9 = int_to_ptr.vmem [resolvable:$true] %s211_s9 }
   0xd   : > { %s3311_s28 = scalar_select %p2861_p3, 1, 0 }
   0xe   : > { %p2437_p5 = pneg %p2861_p3  ;;  %p2556_p7 = scmp.ne.s32.totalorder %s3302_s1, %s2555_s12 }
   0xf   : > { %p2562_p11 = scmp.lt.u32.totalorder %s2555_s12, %s3302_s1 }
  0x10   : > { %p2870_p6 = pnand %p2437_p5, %p3308_p1 }
  0x12   : > { %p2886_p8 = pneg %p2870_p6 }
  0x14   : > { %p2558_p9 = pnand %p2886_p8, %p2556_p7 }
  0x16   : > { %p2559_p10 = pneg %p2558_p9 }
  0x18   : > { %p2564_p12 = pnand %p2562_p11, %p2559_p10 }
  0x1a   : > { %2567 = shalt.err (!%p2564_p12)
}
  0x1b   : > { %s2568_s18 = scalar_lea.vmem %s2859_s26, 512  ;;  %p2576_p5 = scmp.lt.s32.totalorder %s2859_s26, %s2859_s26 }
  0x1c   : > { %p2569_p13 = scmp.ne.s32.totalorder %s2859_s26, %s2568_s18  ;;  %p2577_p4 = scmp.lt.s32.totalorder %s2568_s18, %s2568_s18 }
  0x1e   : > { %p2571_p0 = pnand %p2569_p13, %p2886_p8  ;;  %p2578_p7 = por %p2577_p4, %p2576_p5 }
  0x20   : > { %p2572_p2 = pneg %p2571_p0 }
  0x22   : > { %p2579_p9 = pnand %p2578_p7, %p2572_p2 }
  0x24   : > { %2582 = shalt.err (!%p2579_p9)
}
  0x25   : > { %s2776_s19 = smov 128   ;;  %s2777_s20 = smov 8  }
  0x26   : > { %2440 = dma.hbm_to_vmem [thread:$0]  (!%p2870_p6), %s3302_s1, 512, %s2859_s26, [#allocation10], %s2776_s19, %s2776_s19, %s2777_s20  }
  0x27   : > { %s2583_s11 = scalar_lea.hbm %s3304_s3, 512 }
  0x28   : > { %p2584_p4 = scmp.ne.s32.totalorder %s3304_s3, %s2583_s11  ;;  %p2590_p12 = scmp.lt.u32.totalorder %s2583_s11, %s3304_s3 }
  0x2a   : > { %p2586_p10 = pnand %p2584_p4, %p2886_p8 }
  0x2c   : > { %p2587_p11 = pneg %p2586_p10 }
  0x2e   : > { %p2592_p13 = pnand %p2590_p12, %p2587_p11 }
  0x30   : > { %2595 = shalt.err (!%p2592_p13)
}
  0x31   : > { %s2596_s26 = scalar_lea.vmem %s2874_s30, 512  ;;  %p2604_p7 = scmp.lt.s32.totalorder %s2874_s30, %s2874_s30 }
  0x32   : > { %p2597_p0 = scmp.ne.s32.totalorder %s2874_s30, %s2596_s26  ;;  %p2605_p9 = scmp.lt.s32.totalorder %s2596_s26, %s2596_s26 }
  0x34   : > { %p2599_p2 = pnand %p2597_p0, %p2886_p8  ;;  %p2606_p4 = por %p2605_p9, %p2604_p7 }
  0x36   : > { %p2600_p5 = pneg %p2599_p2 }
  0x38   : > { %p2607_p10 = pnand %p2606_p4, %p2600_p5 }
  0x3a   : > { %2610 = shalt.err (!%p2607_p10)
}
  0x3b   : > { %2446 = dma.hbm_to_vmem [thread:$0]  (!%p2870_p6), %s3304_s3, 512, %s2874_s30, [#allocation13], %s2776_s19, %s2776_s19, %s2777_s20  }
  0x3c   : > { %s2611_s8 = scalar_lea.hbm %s3303_s2, 512 }
  0x3d   : > { %p2612_p11 = scmp.ne.s32.totalorder %s3303_s2, %s2611_s8  ;;  %p2618_p0 = scmp.lt.u32.totalorder %s2611_s8, %s3303_s2 }
  0x3f   : > { %p2614_p12 = pnand %p2612_p11, %p2886_p8 }
  0x41   : > { %p2615_p13 = pneg %p2614_p12 }
  0x43   : > { %p2620_p2 = pnand %p2618_p0, %p2615_p13 }
  0x45   : > { %2623 = shalt.err (!%p2620_p2)
}
  0x46   : > { %s2624_s30 = scalar_lea.vmem %s2876_s9, 512  ;;  %p2632_p4 = scmp.lt.s32.totalorder %s2876_s9, %s2876_s9 }
  0x47   : > { %p2625_p5 = scmp.ne.s32.totalorder %s2876_s9, %s2624_s30  ;;  %p2633_p10 = scmp.lt.s32.totalorder %s2624_s30, %s2624_s30 }
  0x49   : > { %p2627_p7 = pnand %p2625_p5, %p2886_p8  ;;  %p2634_p11 = por %p2633_p10, %p2632_p4 }
  0x4b   : > { %p2628_p9 = pneg %p2627_p7 }
  0x4d   : > { %p2635_p12 = pnand %p2634_p11, %p2628_p9 }
  0x4f   : > { %2638 = shalt.err (!%p2635_p12)
}
  0x50   : > { %2443 = dma.hbm_to_vmem [thread:$0]  (!%p2870_p6), %s3303_s2, 512, %s2876_s9, [#allocation10], %s2776_s19, %s2776_s19, %s2777_s20  }
  0x51   : > { %s2778_s26 = smov [#allocation14]   ;;  %s2639_s29 = scalar_lea.hbm %s3305_s4, 512 }
  0x52   : > { %s237_s17 = sshll.u32 %s2778_s26, 4  ;;  %p2640_p13 = scmp.ne.s32.totalorder %s3305_s4, %s2639_s29  ;;  %s238_s17 = int_to_ptr.vmem [resolvable:$true] %s237_s17 }
  0x53   : > { %p2646_p5 = scmp.lt.u32.totalorder %s2639_s29, %s3305_s4 }
  0x54   : > { %p2642_p0 = pnand %p2640_p13, %p2886_p8 }
  0x56   : > { %p2643_p2 = pneg %p2642_p0 }
  0x58   : > { %p2648_p7 = pnand %p2646_p5, %p2643_p2 }
  0x5a   : > { %2651 = shalt.err (!%p2648_p7)
}
  0x5b   : > { %s2652_s9 = scalar_lea.vmem %s238_s17, 512  ;;  %p2660_p11 = scmp.lt.s32.totalorder %s238_s17, %s238_s17 }
  0x5c   : > { %p2653_p9 = scmp.ne.s32.totalorder %s238_s17, %s2652_s9  ;;  %p2661_p12 = scmp.lt.s32.totalorder %s2652_s9, %s2652_s9 }
  0x5e   : > { %p2655_p4 = pnand %p2653_p9, %p2886_p8  ;;  %p2662_p1 = por %p2661_p12, %p2660_p11 }
  0x60   : > { %p2656_p10 = pneg %p2655_p4 }
  0x62   : > { %p2663_p3 = pnand %p2662_p1, %p2656_p10 }
  0x64   : > { %2666 = shalt.err (!%p2663_p3)
}
  0x65   : > { %2449 = dma.hbm_to_vmem [thread:$0]  (!%p2870_p6), %s3305_s4, 512, %s238_s17, [#allocation13], %s2776_s19, %s2776_s19, %s2777_s20  }
  0x66   : > { %s2168_s7 = sadd.s32 4294967294, %s2771_s24   ;;  %s2985_s15 = sadd.s32 1, %s2771_s24  }
  0x67   : > { %s28_s14 = ssub.s32 %s2771_s24, %s2985_s15  ;;  %s31_s16 = sadd.s32 1, %s2767_s23 }
  0x68   : > { %p29_p1 = scmp.eq.s32.totalorder %s28_s14, 0  ;;  %p38_p3 = scmp.ne.s32.totalorder %s2767_s23, %s2763_s22 }
  0x69   : > { %p39_p8 = scmp.eq.s32.totalorder %s2771_s24, 0  ;;  %p44_p13 = scmp.ne.s32.totalorder %s2763_s22, %s2759_s21 }
  0x6a   : > { %s2996_s26 = scalar_select %p29_p1, %s2767_s23, %s31_s16  }
  0x6b   : > { %p2998_p0 = por %p39_p8, %p38_p3  ;;  %p3315_p2 = scmp.eq.s32.totalorder %s2854_s27, 0 }
  0x6c   : > { %p173_p5 = scmp.eq.s32.totalorder %s2854_s27, 1  ;;  %p179_p7 = scmp.eq.s32.totalorder %s2168_s7, 1 }
  0x6d   : > { %p3004_p6 = por %p3315_p2, %p44_p13  ;;  %p2462_p9 = scmp.lt.s32.totalorder %s2771_s24, 2 }
  0x6e   : > { %s254_s20 = sand.u32 1, %s2767_s23   ;;  %p3011_p4 = por %p173_p5, %p38_p3 }
  0x6f   : > { %p3015_p10 = por %p179_p7, %p44_p13  ;;  %s2175_s29 = sshll.u32 %s254_s20, 3 }
  0x70   : > { %s3317_s17 = scalar_select %p3011_p4, 1, 0 }
  0x71   : > { %s3318_s25 = scalar_select %p3015_p10, 1, 0 }
  0x72   : > { %s2176_s8 = sshll.u32 %s2771_s24, 7  ;;  %s258_s9 = scalar_lea.vmem [#allocation6], %s2175_s29 }
  0x73   : > { %s3023_s12 = scalar_lea.hbm %s3301_s0, %s2176_s8  ;;  %s265_s13 = sshll.u32 %s258_s9, 4  ;;  %s3025_s13 = int_to_ptr.vmem [resolvable:$true] %s265_s13 }
  0x74   : > { %p3029_p11 = pnand %p2462_p9, %p2998_p0  ;;  %s255_s7 = scalar_lea.sflag [#allocation7], %s254_s20 }
  0x75   : > { %s2667_s14 = scalar_lea.hbm %s3023_s12, 128  ;;  %s2672_s8 = scalar_lea.hbm %s3301_s0, 256 }
  0x76   : > { %p2668_p12 = scmp.ne.s32.totalorder %s3023_s12, %s2667_s14  ;;  %p2669_p1 = pneg %p3029_p11 }
  0x77   : > { %p2673_p13 = scmp.lt.u32.totalorder %s3023_s12, %s3301_s0  ;;  %p2674_p0 = scmp.lt.u32.totalorder %s2672_s8, %s2667_s14 }
  0x78   : > { %p2670_p3 = pnand %p2669_p1, %p2668_p12  ;;  %p2676_p5 = scmp.lt.u32.totalorder %s2667_s14, %s3023_s12 }
  0x79   : > { %p2675_p2 = por %p2674_p0, %p2673_p13 }
  0x7a   : > { %p2671_p8 = pneg %p2670_p3 }
  0x7b   : > { %p2677_p7 = por %p2676_p5, %p2675_p2 }
  0x7d   : > { %p2678_p9 = pnand %p2677_p7, %p2671_p8 }
  0x7f   : > { %2681 = shalt.err (!%p2678_p9)
}
  0x80   : > { %s2682_s20 = scalar_lea.vmem %s3025_s13, 128  ;;  %s2779_s11 = smov [#allocation6]  }
  0x81   : > { %p2683_p12 = scmp.ne.s32.totalorder %s3025_s13, %s2682_s20  ;;  %s2687_s9 = sshll.u32 %s2779_s11, 4  ;;  %s2688_s9 = int_to_ptr.vmem [resolvable:$false] %s2687_s9 }
  0x82   : > { %s2689_s16 = scalar_lea.vmem %s2688_s9, 256  ;;  %p2690_p4 = scmp.lt.s32.totalorder %s3025_s13, %s2688_s9 }
  0x83   : > { %p2685_p3 = pnand %p2683_p12, %p2669_p1  ;;  %p2691_p13 = scmp.lt.s32.totalorder %s2689_s16, %s2682_s20 }
  0x85   : > { %p2686_p10 = pneg %p2685_p3  ;;  %p2692_p0 = por %p2691_p13, %p2690_p4 }
  0x87   : > { %p2693_p2 = pnand %p2692_p0, %p2686_p10 }
  0x89   : > { %2696 = shalt.err (!%p2693_p2)
}
  0x8a   : > { %2453 = dma.hbm_to_vmem [thread:$0]  (!%p3029_p11), %s3023_s12, 128, %s3025_s13, %s255_s7  }
  0x8b   : > { %p3320_p8 = scmp.ne.s32.totalorder %s3311_s28, 0 }
  0x8c   : > { %s3061_s14 = sand.u32 (!%p3320_p8), 1, %s2763_s22  }
  0x8d   : > { %274 = sbr.rel (%p3320_p8) target bundleno = 1722 (0x6ba), region = 44  ;;  %s2178_s29 = sshll.u32 (!%p3320_p8), %s3061_s14, 3 }
  0x8e   : > { %s277_s8 = scalar_lea.sflag (!%p3320_p8), [#allocation7], %s3061_s14  ;;  %s3067_s18 = scalar_lea.vmem (!%p3320_p8), [#allocation6], %s2178_s29 }
  0x94   : > { %2742 = dma.done.wait (%p3004_p6), %s277_s8, 128  }
  0x95   : > { %2744 = vsyncadd (%p3004_p6), %s277_s8, 4294967168  ;;  %p3321_p4 = scmp.eq.s32.totalorder %s2854_s27, 0 }
  0x97   : > { %2746 = dma.done.wait (%p3321_p4), [#allocation10], 1024   ;;  %p3322_p10 = pmov %p3321_p4 }
  0x98   : > { %p3323_p11 = pmov %p3321_p4 }
  0x99   : > { %2748 = vsyncadd (%p3322_p10), [#allocation10], 4294966272 }
  0x9a   : > { %2750 = dma.done.wait (%p3323_p11), [#allocation13], 1024   ;;  %p3324_p1 = pmov %p3321_p4 }
  0x9b   : > { %v2780_v0 = vmov 0.0|0.0   ;;  %vm2781_vm0 = vmmov 0   ;;  %v2782_v1 = vmov 0.0   ;;  %v327_v2 = vld [vmem:[#allocation9] sm:$0xff]  ;;  %v328_v3 = vld [vmem:[#allocation9 + $0x8] sm:$0xff]  ;;  %v329_v7 = vld [vmem:[#allocation9 + $0x10] sm:$0xff] }
  0x9c   : > { %2752 = vsyncadd (%p3324_p1), [#allocation13], 4294966272  ;;  %2393 = vmatprep.subr.bf16.mxu0 %v2780_v0  ;;  %2399 = vmatprep.subr.bf16.mxu1 %v2780_v0  ;;  %v406_v4 = vld [vmem:[#allocation11] sm:$0xff]  ;;  %v2394_v5 = vpack.c.bf16 %v328_v3, %v327_v2  ;;  %v407_v6 = vld [vmem:[#allocation11 + $0x8] sm:$0xff]  ;;  %vm331_vm1 = vcmask 261120   ;;  %vm559_vm2 = vcmask 31744  }
  0x9d   : > { %2277 = vmatprep.mubr.msk.f32.mxu0 %vm2781_vm0, %v2782_v1  ;;  %2288 = vmatprep.mubr.msk.f32.mxu1 %vm2781_vm0, %v2782_v1  ;;  %v330_v8 = vld [vmem:[#allocation9 + $0x18] sm:$0xff]  ;;  %v2400_v9 = vpack.c.bf16 %v407_v6, %v406_v4  ;;  %v408_v10 = vld [vmem:[#allocation11 + $0x10] sm:$0xff]  ;;  %v481_v15 = vld [vmem:[#allocation12] sm:$0xff]  ;;  %s2783_s28 = smov 124   ;;  %s2784_s19 = smov 120   ;;  %vm636_vm3 = vcmask 64512  }
  0x9e   : > { %v409_v11 = vld [vmem:[#allocation11 + $0x18] sm:$0xff]  ;;  %2395 = vmatpush3.bf16.msra.mxu0 %v2394_v5  ;;  %v2397_v12 = vpack.c.bf16 %v330_v8, %v329_v7  ;;  %v482_v16 = vld [vmem:[#allocation12 + $0x8] sm:$0xff]  ;;  %v483_v17 = vld [vmem:[#allocation12 + $0x10] sm:$0xff]  ;;  %s2785_s12 = smov 116   ;;  %s2786_s13 = smov 112   ;;  %vm897_vm4 = vcmask 64544  }
  0x9f   : > { %2401 = vmatpush3.bf16.msra.mxu1 %v2400_v9  ;;  %2396 = vmatprep.subr.bf16.mxu0 %v2780_v0  ;;  %v2403_v13 = vpack.c.bf16 %v409_v11, %v408_v10  ;;  %v326_v14 = vld [vmem:[%s3067_s18] sm:$0xff]  ;;  %v2406_v18 = vpack.c.bf16 %v482_v16, %v481_v15  ;;  %s2787_s30 = smov 108   ;;  %s2788_s7 = smov 104   ;;  %vm1074_vm5 = vcmask 97344   ;;  %vm1251_vm6 = vcmask 130144  }
  0xa0   : > { %2402 = vmatprep.subr.bf16.mxu1 %v2780_v0  ;;  %v484_v19 = vld [vmem:[#allocation12 + $0x18] sm:$0xff]  ;;  %s2789_s10 = smov 100   ;;  %s2790_s20 = smov 4   ;;  %vm1428_vm7 = vcmask 162944   ;;  %vm1605_vm8 = vcmask 195744   ;;  %vm1782_vm9 = vcmask 228544  }
  0xa1   : > { %v2409_v20 = vpack.c.bf16 %v484_v19, %v483_v17  ;;  %s2791_s11 = smov 8   ;;  %s2792_s9 = smov 12   ;;  %vm1959_vm10 = vcmask 261344  }
  0xa2   : > { %2398 = vmatpush3.bf16.msra.mxu0 %v2397_v12  ;;  %s2793_s16 = smov 16   ;;  %s2794_s8 = smov 20  }
  0xa3   : > { %2404 = vmatpush3.bf16.msra.mxu1 %v2403_v13  ;;  %2405 = vmatprep.subr.bf16.mxu0 %v2780_v0  ;;  %s2795_s18 = smov 24   ;;  %p3325_p5 = scmp.ne.s32.totalorder %s3317_s17, 0 }
  0xa4   : > { %2302 = vmatprep.subr.mxu1 %v2782_v1 }
  0xa5   : > { %2278 = vmatmul.mubr.msk.f32.vlgmr.msra.gmra.mrb[0].mxu0 %vm331_vm1, %v326_v14 }
  0xa6   : > { %2289 = vmatmul.mubr.msk.f32.vlgmr.msra.gmra.mrb[0].mxu1 %vm331_vm1, %v326_v14  ;;  %2299 = vmatprep.mubr.msk.f32.mxu0 %vm2781_vm0, %v2782_v1 }
  0xa7   : > { %2304 = vmatprep.mubr.msk.f32.mxu1 %vm2781_vm0, %v2782_v1  ;;  %2407 = vmatpush3.bf16.msra.mxu0 %v2406_v18 }
  0xa8   : > { %2408 = vmatprep.subr.bf16.mxu0 %v2780_v0 }
  0xab   : > { %2410 = vmatpush3.bf16.msra.mxu0 %v2409_v20 }
  0xac   : > { %2322 = vmatprep.subr.mxu0 %v2782_v1 }
  0xae   : > { %2300 = vmatmul.mubr.msk.f32.vlgmr.msra.gmra.mrb[2].mxu0 %vm331_vm1, %v326_v14 }
  0xaf   : > { %2324 = vmatprep.mubr.msk.f32.mxu0 %vm2781_vm0, %v2782_v1 }
 0x178   : > { %v401_v21 = vpop.f32.mrb[0].mxu0 }
 0x179   : > { %405 = vst.msk [vmem:[#allocation2] sm:$0xff] %vm331_vm1, %v401_v21  ;;  %v476_v22 = vpop.f32.mrb[0].mxu1  ;;  %v2279_v23 = vpop.f32.mrb[1].mxu0 }
 0x17a   : > { %480 = vst.msk [vmem:[#allocation3] sm:$0xff] %vm331_vm1, %v476_v22  ;;  %v2290_v24 = vpop.f32.mrb[1].mxu1 }
 0x180   : > { %v722_v25 = vld [vmem:[#allocation2] sm:$0xff] }
 0x181   : > { %v557_v26 = vld [vmem:[#allocation3] sm:$0xff]  ;;  %726 = vrot.lane.b32.xlu1 %v722_v25, %s2783_s28  ;;  %v551_v31 = vpop.f32.mrb[2].mxu0 }
 0x182   : > { %2303 = vmatpush3.xpose.msk.msra.mxu1 %vm559_vm2, %v557_v26  ;;  %555 = vst.msk [vmem:[#allocation4] sm:$0xff] %vm331_vm1, %v551_v31  ;;  %v2301_v33 = vpop.f32.mrb[3].mxu0 }
 0x183   : > { %2307 = vmatprep.subr.mxu1 %v2782_v1 }
 0x185   : > { %2305 = vmatmul.mubr.msk.f32.vlgmr.msra.gmra.mrb[2].mxu1 %vm559_vm2, %v722_v25  ;;  %906 = vrot.lane.b32.xlu1 %v557_v26, %s2784_s19 }
 0x186   : > { %2309 = vmatprep.mubr.msk.f32.mxu1 %vm2781_vm0, %v2782_v1 }
 0x189   : > { %903 = vrot.lane.b32.xlu1 %v722_v25, %s2784_s19  ;;  %v3139_v39 = vld [vmem:[#allocation4] sm:$0xff] }
 0x18a   : > { %2308 = vmatpush3.msra.mxu1 %v3139_v39 }
 0x18b   : > { %2312 = vmatprep.subr.mxu1 %v2782_v1 }
 0x18d   : > { %1083 = vrot.lane.b32.xlu1 %v557_v26, %s2785_s12 }
 0x191   : > { %1080 = vrot.lane.b32.xlu1 %v722_v25, %s2785_s12 }
 0x195   : > { %1260 = vrot.lane.b32.xlu1 %v557_v26, %s2786_s13 }
 0x199   : > { %1257 = vrot.lane.b32.xlu1 %v722_v25, %s2786_s13 }
 0x19d   : > { %1434 = vrot.lane.b32.xlu1 %v722_v25, %s2787_s30 }
 0x1a1   : > { %1611 = vrot.lane.b32.xlu1 %v722_v25, %s2788_s7 }
 0x1a5   : > { %1788 = vrot.lane.b32.xlu1 %v722_v25, %s2789_s10 }
 0x1f3   : > { %v3120_v27 = vpop.permute.xlu1 %726 }
 0x1f7   : > { %v907_v28 = vpop.permute.xlu1 %906 }
 0x1f8   : > { %2323 = vmatpush3.xpose.msk.msra.mxu0 %vm559_vm2, %v907_v28 }
 0x1f9   : > { %2332 = vmatprep.subr.mxu0 %v2782_v1 }
 0x1fb   : > { %v904_v29 = vpop.permute.xlu1 %903 }
 0x1fc   : > { %2325 = vmatmul.mubr.msk.f32.vlgmr.msra.gmra.mrb[4].mxu0 %vm559_vm2, %v904_v29 }
 0x1fd   : > { %2334 = vmatprep.mubr.msk.f32.mxu0 %vm2781_vm0, %v2782_v1 }
 0x1ff   : > { %v1084_v30 = vpop.permute.xlu1 %1083 }
 0x200   : > { %2333 = vmatpush3.xpose.msk.msra.mxu0 %vm559_vm2, %v1084_v30 }
 0x201   : > { %2342 = vmatprep.subr.mxu0 %v2782_v1 }
 0x203   : > { %v1081_v32 = vpop.permute.xlu1 %1080 }
 0x204   : > { %2335 = vmatmul.mubr.msk.f32.vlgmr.msra.gmra.mrb[6].mxu0 %vm559_vm2, %v1081_v32 }
 0x205   : > { %2344 = vmatprep.mubr.msk.f32.mxu0 %vm2781_vm0, %v2782_v1 }
 0x207   : > { %v1261_v34 = vpop.permute.xlu1 %1260 }
 0x208   : > { %2343 = vmatpush3.xpose.msk.msra.mxu0 %vm559_vm2, %v1261_v34 }
 0x209   : > { %2352 = vmatprep.subr.mxu0 %v2782_v1 }
 0x20b   : > { %v1258_v35 = vpop.permute.xlu1 %1257 }
 0x20c   : > { %2345 = vmatmul.mubr.msk.f32.vlgmr.msra.gmra.mrb[8].mxu0 %vm559_vm2, %v1258_v35 }
 0x20d   : > { %2354 = vmatprep.mubr.msk.f32.mxu0 %vm2781_vm0, %v2782_v1 }
 0x20f   : > { %v1435_v53 = vpop.permute.xlu1 %1434 }
 0x213   : > { %v1612_v56 = vpop.permute.xlu1 %1611 }
 0x217   : > { %v1789_v59 = vpop.permute.xlu1 %1788 }
 0x258   : > { %v632_v36 = vpop.f32.mrb[2].mxu1 }
 0x259   : > { %v2306_v37 = vpop.f32.mrb[3].mxu1  ;;  %v637_v38 = vsel %vm636_vm3, %v632_v36, -inf }
 0x25a   : > { %638 = vmax.xlane.f32.xlu0 %v637_v38 }
 0x270   : > { %729 = vrot.lane.b32.xlu0 %v557_v26, %s2783_s28 }
 0x274   : > { %1437 = vrot.lane.b32.xlu0 %v557_v26, %s2787_s30 }
 0x278   : > { %1614 = vrot.lane.b32.xlu0 %v557_v26, %s2788_s7 }
 0x27c   : > { %1791 = vrot.lane.b32.xlu0 %v557_v26, %s2789_s10 }
 0x2cf   : > { %v3147_v40 = vpop.f32.mrb[4].mxu0 }
 0x2d0   : > { %v2326_v41 = vpop.f32.mrb[5].mxu0  ;;  %v982_v42 = vsel %vm636_vm3, %v3147_v40, -inf }
 0x2d1   : > { %983 = vmax.xlane.f32.xlu1 %v982_v42 }
 0x2d7   : > { %v3151_v43 = vpop.f32.mrb[6].mxu0 }
 0x2d8   : > { %v2336_v44 = vpop.f32.mrb[7].mxu0  ;;  %v1159_v45 = vsel %vm636_vm3, %v3151_v43, -inf }
 0x2d9   : > { %1160 = vmax.xlane.f32.xlu0 %v1159_v45 }
 0x2df   : > { %v3155_v46 = vpop.f32.mrb[8].mxu0 }
 0x2e0   : > { %v2346_v47 = vpop.f32.mrb[9].mxu0  ;;  %v1336_v48 = vsel %vm636_vm3, %v3155_v46, -inf }
 0x2e1   : > { %1337 = vmax.xlane.f32.xlu0 %v1336_v48 }
 0x2e7   : > { %v639_v49 = vpop.xlane.xlu0 %638 }
 0x2e8   : > { %v640_v50 = vsub.f32 %v632_v36, %v639_v49 }
 0x2ea   : > { %v641_v51 = vmul.f32 1.442695, %v640_v50 }
 0x2eb   : > { %v730_v52 = vpop.permute.xlu0 %729 }
 0x2ec   : > { %2523 = vpow2.f32 %v641_v51 }
 0x2ef   : > { %v1438_v54 = vpop.permute.xlu0 %1437 }
 0x2f0   : > { %2353 = vmatpush3.xpose.msk.msra.mxu0 %vm559_vm2, %v1438_v54 }
 0x2f1   : > { %2362 = vmatprep.subr.mxu0 %v2782_v1 }
 0x2f3   : > { %2355 = vmatmul.mubr.msk.f32.vlgmr.msra.gmra.mrb[10].mxu0 %vm559_vm2, %v1435_v53  ;;  %v1615_v55 = vpop.permute.xlu0 %1614 }
 0x2f4   : > { %2363 = vmatpush3.xpose.msk.msra.mxu0 %vm559_vm2, %v1615_v55  ;;  %2364 = vmatprep.mubr.msk.f32.mxu0 %vm2781_vm0, %v2782_v1 }
 0x2f5   : > { %2372 = vmatprep.subr.mxu0 %v2782_v1 }
 0x2f6   : > { %v3166_v57 = vpop.eup %2523 }
 0x2f7   : > { %2365 = vmatmul.mubr.msk.f32.vlgmr.msra.gmra.mrb[12].mxu0 %vm559_vm2, %v1612_v56  ;;  %v1792_v58 = vpop.permute.xlu0 %1791  ;;  %2310 = vmatmul.mubr.msk.f32.vlgmr.msra.gmra.mrb[4].mxu1 %vm636_vm3, %v3166_v57 }
 0x2f8   : > { %2313 = vmatpush3.xpose.msk.msra.mxu1 %vm559_vm2, %v730_v52  ;;  %2373 = vmatpush3.xpose.msk.msra.mxu0 %vm559_vm2, %v1792_v58  ;;  %v643_v52 = vsel %vm636_vm3, %v3166_v57, 0.0 }
 0x2f9   : > { %2314 = vmatprep.mubr.msk.f32.mxu1 %vm2781_vm0, %v2782_v1  ;;  %2374 = vmatprep.mubr.msk.f32.mxu0 %vm2781_vm0, %v2782_v1 }
 0x2fa   : > { %2317 = vmatprep.subr.mxu1 %v2782_v1  ;;  %2411 = vmatprep.subr.bf16.mxu0 %v2780_v0 }
 0x2fb   : > { %2315 = vmatmul.mubr.msk.f32.vlgmr.msra.gmra.mrb[6].mxu1 %vm559_vm2, %v3120_v27  ;;  %2375 = vmatmul.mubr.msk.f32.vlgmr.msra.gmra.mrb[14].mxu0 %vm559_vm2, %v1789_v59 }
 0x2fc   : > { %2319 = vmatprep.mubr.msk.f32.mxu1 %vm2781_vm0, %v2782_v1  ;;  %2390 = vmatprep.mubr.msk.f32.mxu0 %vm2781_vm0, %v2782_v1 }
 0x35e   : > { %v984_v14 = vpop.xlane.xlu1 %983 }
 0x35f   : > { %v985_v15 = vsub.f32 %v3147_v40, %v984_v14 }
 0x361   : > { %v986_v17 = vmul.f32 1.442695, %v985_v15 }
 0x366   : > { %v1161_v12 = vpop.xlane.xlu0 %1160 }
 0x367   : > { %v1162_v13 = vsub.f32 %v3151_v43, %v1161_v12 }
 0x369   : > { %v1163_v16 = vmul.f32 1.442695, %v1162_v13 }
 0x36b   : > { %2525 = vpow2.f32 %v1163_v16 }
 0x36c   : > { %2527 = vpow2.f32 %v986_v17 }
 0x36e   : > { %v1338_v22 = vpop.xlane.xlu0 %1337 }
 0x36f   : > { %v1339_v27 = vsub.f32 %v3155_v46, %v1338_v22  ;;  %v1965_v22 = vld [vmem:[#allocation14 + $0x18] sm:$0xff] }
 0x371   : > { %v1340_v32 = vmul.f32 1.442695, %v1339_v27 }
 0x375   : > { %v2526_v18 = vpop.eup %2525 }
 0x376   : > { %v1165_v19 = vsel %vm636_vm3, %v2526_v18, 0.0  ;;  %v2528_v20 = vpop.eup %2527 }
 0x377   : > { %v988_v21 = vsel %vm636_vm3, %v2528_v20, 0.0 }
 0x3c6   : > { %v1509_v60 = vpop.f32.mrb[10].mxu0 }
 0x3c7   : > { %v2356_v61 = vpop.f32.mrb[11].mxu0  ;;  %v1513_v62 = vsel %vm636_vm3, %v1509_v60, -inf }
 0x3c8   : > { %1514 = vmax.xlane.f32.xlu1 %v1513_v62 }
 0x3ca   : > { %v3187_v63 = vpop.f32.mrb[4].mxu1  ;;  %v1686_v2 = vpop.f32.mrb[12].mxu0 }
 0x3cb   : > { %v2311_v3 = vpop.f32.mrb[5].mxu1  ;;  %v2366_v4 = vpop.f32.mrb[13].mxu0  ;;  %v1690_v5 = vsel %vm636_vm3, %v1686_v2, -inf }
 0x3cc   : > { %1691 = vmax.xlane.f32.xlu0 %v1690_v5 }
 0x3ce   : > { %v801_v6 = vpop.f32.mrb[6].mxu1  ;;  %v1863_v7 = vpop.f32.mrb[14].mxu0 }
 0x3cf   : > { %v2316_v8 = vpop.f32.mrb[7].mxu1  ;;  %v2376_v9 = vpop.f32.mrb[15].mxu0  ;;  %v805_v10 = vsel %vm636_vm3, %v801_v6, -inf  ;;  %v1867_v11 = vsel %vm636_vm3, %v1863_v7, -inf }
 0x3d0   : > { %806 = vmax.xlane.f32.xlu0 %v805_v10  ;;  %1868 = vmax.xlane.f32.xlu1 %v1867_v11 }
 0x3e1   : > { %992 = vrot.lane.b32.xlu1 %v3139_v39, %s2784_s19 }
 0x3e5   : > { %1169 = vrot.lane.b32.xlu1 %v3139_v39, %s2785_s12 }
 0x3e6   : > { %815 = vrot.lane.b32.xlu0 %v3139_v39, %s2783_s28  ;;  %s2796_s28 = smov 28  }
 0x3e9   : > { %1523 = vrot.lane.b32.xlu1 %v3139_v39, %s2787_s30  ;;  %s324_s30 = scalar_lea.vmem [#allocation15], %s2178_s29  ;;  %s2797_s29 = smov [#allocation15]  }
 0x3ea   : > { %1346 = vrot.lane.b32.xlu0 %v3139_v39, %s2786_s13  ;;  %s2214_s13 = sshll.u32 %s2854_s27, 7 }
 0x3ed   : > { %1877 = vrot.lane.b32.xlu1 %v3139_v39, %s2789_s10 }
 0x3ee   : > { %1700 = vrot.lane.b32.xlu0 %v3139_v39, %s2788_s7  ;;  %s2060_s7 = sshll.u32 %s324_s30, 4  ;;  %s3258_s7 = int_to_ptr.vmem [resolvable:$true] %s2060_s7 }
 0x3ef   : > { %s2697_s27 = scalar_lea.vmem %s3258_s7, 128 }
 0x3f0   : > { %p2698_p6 = scmp.ne.s32.totalorder %s3258_s7, %s2697_s27 }
 0x3f2   : > { %p2699_p7 = pnand %p2698_p6, %p3325_p5 }
 0x3f4   : > { %p2700_p9 = pneg %p2699_p7 }
 0x40d   : > { %1166 = vadd.xlane.f32.xlu0 %v1165_v19  ;;  %v1963_v19 = vld [vmem:[#allocation14 + $0x8] sm:$0xff] }
 0x411   : > { %989 = vadd.xlane.f32.xlu1 %v988_v21  ;;  %v1964_v21 = vld [vmem:[#allocation14 + $0x10] sm:$0xff] }
 0x455   : > { %v1515_v23 = vpop.xlane.xlu1 %1514 }
 0x456   : > { %v1516_v24 = vsub.f32 %v1509_v60, %v1515_v23 }
 0x458   : > { %v1517_v25 = vmul.f32 1.442695, %v1516_v24 }
 0x459   : > { %v1692_v26 = vpop.xlane.xlu0 %1691 }
 0x45a   : > { %2529 = vpow2.f32 %v1517_v25  ;;  %v1693_v33 = vsub.f32 %v1686_v2, %v1692_v26  ;;  %v2415_v25 = vpack.c.bf16 %v1965_v22, %v1964_v21 }
 0x45c   : > { %v1694_v38 = vmul.f32 1.442695, %v1693_v33 }
 0x45d   : > { %v807_v28 = vpop.xlane.xlu0 %806  ;;  %v1869_v29 = vpop.xlane.xlu1 %1868 }
 0x45e   : > { %v808_v30 = vsub.f32 %v801_v6, %v807_v28  ;;  %v1870_v31 = vsub.f32 %v1863_v7, %v1869_v29 }
 0x460   : > { %v809_v34 = vmul.f32 1.442695, %v808_v30  ;;  %v1871_v35 = vmul.f32 1.442695, %v1870_v31 }
 0x461   : > { %v816_v36 = vpop.permute.xlu0 %815  ;;  %v993_v40 = vpop.permute.xlu1 %992 }
 0x462   : > { %2531 = vpow2.f32 %v809_v34  ;;  %2318 = vmatpush3.msra.mxu1 %v816_v36 }
 0x463   : > { %2533 = vpow2.f32 %v1871_v35  ;;  %2327 = vmatprep.subr.mxu1 %v2782_v1 }
 0x464   : > { %v2530_v37 = vpop.eup %2529  ;;  %2535 = vpow2.f32 %v1340_v32 }
 0x465   : > { %v1519_v39 = vsel %vm636_vm3, %v2530_v37, 0.0  ;;  %2537 = vpow2.f32 %v1694_v38  ;;  %v1170_v46 = vpop.permute.xlu1 %1169  ;;  %v1347_v49 = vpop.permute.xlu0 %1346 }
 0x466   : > { %1520 = vadd.xlane.f32.xlu1 %v1519_v39 }
 0x469   : > { %v1524_v51 = vpop.permute.xlu1 %1523  ;;  %v1701_v53 = vpop.permute.xlu0 %1700 }
 0x46c   : > { %v2532_v41 = vpop.eup %2531 }
 0x46d   : > { %v2534_v42 = vpop.eup %2533  ;;  %2320 = vmatmul.mubr.msk.f32.vlgmr.msra.gmra.mrb[8].mxu1 %vm636_vm3, %v2532_v41  ;;  %v811_v43 = vsel %vm636_vm3, %v2532_v41, 0.0  ;;  %v1878_v54 = vpop.permute.xlu1 %1877 }
 0x46e   : > { %v2536_v44 = vpop.eup %2535  ;;  %2328 = vmatpush3.msra.mxu1 %v993_v40  ;;  %812 = vadd.xlane.f32.xlu0 %v811_v43  ;;  %v1873_v45 = vsel %vm636_vm3, %v2534_v42, 0.0  ;;  %v2211_v43 = vld [vmem:[%s3306_s5] ss:$0 sm:$0xff] }
 0x46f   : > { %1874 = vadd.xlane.f32.xlu1 %v1873_v45  ;;  %2329 = vmatprep.mubr.msk.f32.mxu1 %vm2781_vm0, %v2782_v1  ;;  %v1342_v47 = vsel %vm636_vm3, %v2536_v44, 0.0  ;;  %v2538_v48 = vpop.eup %2537 }
 0x470   : > { %2337 = vmatprep.subr.mxu1 %v2782_v1  ;;  %v1696_v50 = vsel %vm636_vm3, %v2538_v48, 0.0 }
 0x471   : > { %2330 = vmatmul.mubr.msk.f32.vlgmr.msra.gmra.mrb[10].mxu1 %vm636_vm3, %v2528_v20 }
 0x472   : > { %2338 = vmatpush3.msra.mxu1 %v1170_v46  ;;  %1343 = vadd.xlane.f32.xlu0 %v1342_v47 }
 0x473   : > { %2339 = vmatprep.mubr.msk.f32.mxu1 %vm2781_vm0, %v2782_v1  ;;  %2347 = vmatprep.subr.mxu1 %v2782_v1 }
 0x475   : > { %2340 = vmatmul.mubr.msk.f32.vlgmr.msra.gmra.mrb[12].mxu1 %vm636_vm3, %v2526_v18  ;;  %v1962_v18 = vld [vmem:[#allocation14] sm:$0xff] }
 0x476   : > { %2348 = vmatpush3.msra.mxu1 %v1347_v49  ;;  %1697 = vadd.xlane.f32.xlu0 %v1696_v50  ;;  %v2412_v20 = vpack.c.bf16 %v1963_v19, %v1962_v18 }
 0x477   : > { %2349 = vmatprep.mubr.msk.f32.mxu1 %vm2781_vm0, %v2782_v1  ;;  %2357 = vmatprep.subr.mxu1 %v2782_v1 }
 0x478   : > { %2413 = vmatpush3.bf16.msra.mxu0 %v2412_v20 }
 0x479   : > { %2350 = vmatmul.mubr.msk.f32.vlgmr.msra.gmra.mrb[14].mxu1 %vm636_vm3, %v2536_v44  ;;  %2414 = vmatprep.subr.bf16.mxu0 %v2780_v0 }
 0x47a   : > { %2358 = vmatpush3.msra.mxu1 %v1524_v51  ;;  %644 = vadd.xlane.f32.xlu0 %v643_v52 }
 0x47b   : > { %2359 = vmatprep.mubr.msk.f32.mxu1 %vm2781_vm0, %v2782_v1  ;;  %2367 = vmatprep.subr.mxu1 %v2782_v1 }
 0x47c   : > { %2416 = vmatpush3.bf16.msra.mxu0 %v2415_v25 }
 0x47d   : > { %2360 = vmatmul.mubr.msk.f32.vlgmr.msra.gmra.mrb[16].mxu1 %vm636_vm3, %v2530_v37 }
 0x47e   : > { %2368 = vmatpush3.msra.mxu1 %v1701_v53  ;;  %2369 = vmatprep.mubr.msk.f32.mxu1 %vm2781_vm0, %v2782_v1 }
 0x47f   : > { %2377 = vmatprep.subr.mxu1 %v2782_v1 }
 0x481   : > { %2370 = vmatmul.mubr.msk.f32.vlgmr.msra.gmra.mrb[18].mxu1 %vm636_vm3, %v2538_v48 }
 0x482   : > { %2378 = vmatpush3.msra.mxu1 %v1878_v54  ;;  %2379 = vmatprep.mubr.msk.f32.mxu1 %vm2781_vm0, %v2782_v1 }
 0x485   : > { %2380 = vmatmul.mubr.msk.f32.vlgmr.msra.gmra.mrb[20].mxu1 %vm636_vm3, %v2534_v42 }
 0x49a   : > { %v1167_v55 = vpop.xlane.xlu0 %1166 }
 0x49e   : > { %v990_v62 = vpop.xlane.xlu1 %989 }
 0x4f3   : > { %v1521_v5 = vpop.xlane.xlu1 %1520 }
 0x4fb   : > { %v813_v56 = vpop.xlane.xlu0 %812 }
 0x4fc   : > { %v1875_v13 = vpop.xlane.xlu1 %1874 }
 0x4ff   : > { %v1344_v57 = vpop.xlane.xlu0 %1343 }
 0x503   : > { %v1698_v58 = vpop.xlane.xlu0 %1697 }
 0x507   : > { %v645_v59 = vpop.xlane.xlu0 %644 }
 0x508   : > { %2539 = vrcp.f32 %v645_v59 }
 0x509   : > { %2541 = vrcp.f32 %v813_v56 }
 0x50a   : > { %2543 = vrcp.f32 %v990_v62 }
 0x50b   : > { %2545 = vrcp.f32 %v1167_v55 }
 0x50c   : > { %2547 = vrcp.f32 %v1344_v57 }
 0x50d   : > { %2549 = vrcp.f32 %v1521_v5 }
 0x50e   : > { %2551 = vrcp.f32 %v1698_v58 }
 0x50f   : > { %2553 = vrcp.f32 %v1875_v13 }
 0x512   : > { %v2540_v60 = vpop.eup %2539 }
 0x513   : > { %v720_v61 = vmul.f32 %v2540_v60, %v3187_v63  ;;  %v2542_v2 = vpop.eup %2541 }
 0x514   : > { %v2544_v6 = vpop.eup %2543 }
 0x515   : > { %721 = vst.msk [vmem:[#allocation5] sm:$0xff] %vm559_vm2, %v720_v61  ;;  %v2546_v63 = vpop.eup %2545 }
 0x516   : > { %v2548_v14 = vpop.eup %2547 }
 0x517   : > { %v2550_v23 = vpop.eup %2549 }
 0x518   : > { %v2552_v28 = vpop.eup %2551 }
 0x519   : > { %v2554_v32 = vpop.eup %2553 }
 0x540   : > { %v887_v3 = vpop.f32.mrb[8].mxu1 }
 0x541   : > { %v892_v1 = vmul.f32 %v2542_v2, %v887_v3  ;;  %v2321_v4 = vpop.f32.mrb[9].mxu1 }
 0x543   : > { %894 = vrot.lane.b32.xlu1 %v892_v1, %s2790_s20 }
 0x544   : > { %v1064_v7 = vpop.f32.mrb[10].mxu1 }
 0x545   : > { %v1069_v8 = vmul.f32 %v2544_v6, %v1064_v7  ;;  %v2331_v9 = vpop.f32.mrb[11].mxu1 }
 0x547   : > { %1071 = vrot.lane.b32.xlu0 %v1069_v8, %s2791_s11  ;;  %s3256_s11 = scalar_lea.hbm %s3307_s6, %s2214_s13 }
 0x548   : > { %v1241_v10 = vpop.f32.mrb[12].mxu1 }
 0x549   : > { %v1246_v11 = vmul.f32 %v2546_v63, %v1241_v10  ;;  %v2341_v12 = vpop.f32.mrb[13].mxu1 }
 0x54b   : > { %1248 = vrot.lane.b32.xlu1 %v1246_v11, %s2792_s9  ;;  %s2047_s9 = scalar_lea.sflag [#allocation8], %s3061_s14 }
 0x54c   : > { %v1418_v15 = vpop.f32.mrb[14].mxu1 }
 0x54d   : > { %v1423_v16 = vmul.f32 %v2548_v14, %v1418_v15  ;;  %v2351_v17 = vpop.f32.mrb[15].mxu1 }
 0x54f   : > { %1425 = vrot.lane.b32.xlu1 %v1423_v16, %s2793_s16  ;;  %s2701_s16 = sshll.u32 %s2797_s29, 4  ;;  %s2702_s16 = int_to_ptr.vmem [resolvable:$false] %s2701_s16 }
 0x550   : > { %v1595_v24 = vpop.f32.mrb[16].mxu1  ;;  %p2704_p12 = scmp.lt.s32.totalorder %s3258_s7, %s2702_s16 }
 0x551   : > { %v1600_v26 = vmul.f32 %v2550_v23, %v1595_v24  ;;  %v2361_v27 = vpop.f32.mrb[17].mxu1 }
 0x553   : > { %1602 = vrot.lane.b32.xlu0 %v1600_v26, %s2794_s8  ;;  %s2703_s8 = scalar_lea.vmem %s2702_s16, 256 }
 0x554   : > { %v1772_v29 = vpop.f32.mrb[18].mxu1  ;;  %p2705_p3 = scmp.lt.s32.totalorder %s2703_s8, %s2697_s27 }
 0x555   : > { %v1777_v30 = vmul.f32 %v2552_v28, %v1772_v29  ;;  %v2371_v31 = vpop.f32.mrb[19].mxu1 }
 0x556   : > { %p2706_p13 = por %p2705_p3, %p2704_p12 }
 0x557   : > { %1779 = vrot.lane.b32.xlu1 %v1777_v30, %s2795_s18 }
 0x558   : > { %v1949_v33 = vpop.f32.mrb[20].mxu1  ;;  %p2707_p0 = pnand %p2706_p13, %p2700_p9 }
 0x559   : > { %v1954_v34 = vmul.f32 %v2554_v32, %v1949_v33  ;;  %v2381_v35 = vpop.f32.mrb[21].mxu1 }
 0x55b   : > { %1956 = vrot.lane.b32.xlu0 %v1954_v34, %s2796_s28 }
 0x5b5   : > { %v895_v36 = vpop.permute.xlu1 %894 }
 0x5b6   : > { %898 = vst.msk [vmem:[#allocation5] sm:$0xff] %vm897_vm4, %v895_v36 }
 0x5b9   : > { %v1072_v0 = vpop.permute.xlu0 %1071 }
 0x5ba   : > { %1075 = vst.msk [vmem:[#allocation5] sm:$0xff] %vm1074_vm5, %v1072_v0 }
 0x5bd   : > { %v1249_v37 = vpop.permute.xlu1 %1248 }
 0x5be   : > { %1252 = vst.msk [vmem:[#allocation5] sm:$0xff] %vm1251_vm6, %v1249_v37 }
 0x5c1   : > { %v1426_v38 = vpop.permute.xlu1 %1425 }
 0x5c2   : > { %1429 = vst.msk [vmem:[#allocation5] sm:$0xff] %vm1428_vm7, %v1426_v38 }
 0x5c5   : > { %v1603_v39 = vpop.permute.xlu0 %1602 }
 0x5c6   : > { %1606 = vst.msk [vmem:[#allocation5] sm:$0xff] %vm1605_vm8, %v1603_v39 }
 0x5c9   : > { %v1780_v40 = vpop.permute.xlu1 %1779 }
 0x5ca   : > { %1783 = vst.msk [vmem:[#allocation5] sm:$0xff] %vm1782_vm9, %v1780_v40 }
 0x5cd   : > { %v1957_v41 = vpop.permute.xlu0 %1956 }
 0x5ce   : > { %1960 = vst.msk [vmem:[#allocation5] sm:$0xff] %vm1959_vm10, %v1957_v41 }
 0x5d5   : > { %v1961_v42 = vld [vmem:[#allocation5] sm:$0xff] }
 0x5d6   : > { %2391 = vmatmul.mubr.msk.f32.vlgmr.msra.gmra.mrb[16].mxu0 %vm331_vm1, %v1961_v42 }
 0x6a9   : > { %v2041_v44 = vpop.f32.mrb[16].mxu0 }
 0x6aa   : > { %v2042_v45 = vadd.f32 %v2211_v43, %v2041_v44  ;;  %v2392_v46 = vpop.f32.mrb[17].mxu0 }
 0x6ac   : > { %2045 = vst.msk [vmem:[%s324_s30] sm:$0xff] %vm331_vm1, %v2042_v45 }
 0x6ad   : > { %2710 = shalt.err (!%p2707_p0)
}
 0x6ae   : > { %s2711_s14 = scalar_lea.hbm %s3256_s11, 128  ;;  %s2715_s19 = scalar_lea.hbm %s3307_s6, 256 }
 0x6af   : > { %p2712_p2 = scmp.ne.s32.totalorder %s3256_s11, %s2711_s14  ;;  %p2716_p10 = scmp.lt.u32.totalorder %s3256_s11, %s3307_s6 }
 0x6b0   : > { %p2717_p11 = scmp.lt.u32.totalorder %s2715_s19, %s2711_s14  ;;  %p2719_p6 = scmp.lt.u32.totalorder %s2711_s14, %s3256_s11 }
 0x6b1   : > { %p2713_p8 = pnand %p2712_p2, %p3325_p5 }
 0x6b2   : > { %p2718_p1 = por %p2717_p11, %p2716_p10 }
 0x6b3   : > { %p2714_p4 = pneg %p2713_p8 }
 0x6b4   : > { %p2720_p7 = por %p2719_p6, %p2718_p1 }
 0x6b6   : > { %p2721_p9 = pnand %p2720_p7, %p2714_p4 }
 0x6b8   : > { %2724 = shalt.err (!%p2721_p9)
}
 0x6b9   : > { %2435 = dma.vmem_to_hbm [thread:$0]  (%p3325_p5), %s3258_s7, 128, %s3256_s11, %s2047_s9  }
 0x6ba PF: > { %s2072_s30 = sand.u32 1, %s2759_s21   ;;  %p3326_p12 = scmp.ne.s32.totalorder %s3318_s25, 0 }
 0x6bb   : > { %p3327_p3 = scmp.ge.s32.totalorder %s2771_s24, 2  ;;  %s2073_s10 = scalar_lea.sflag [#allocation8], %s2072_s30 }
 0x6bd   : > { %p2455_p13 = pnand %p3327_p3, %p3326_p12 }
 0x6bf   : > { %2754 = dma.done.wait (!%p2455_p13), %s2073_s10, 128  }
 0x6c0   : > { %2756 = vsyncadd (!%p2455_p13), %s2073_s10, 4294967168  ;;  %p21_p0 = scmp.ge.s32.totalorder %s2985_s15, 4   ;;  %s3328_s21 = smov %s2763_s22 }
 0x6c1   : > { %s3329_s22 = smov %s2767_s23  ;;  %s3330_s23 = smov %s2996_s26 }
 0x6c2   : > { %s3331_s24 = smov %s2985_s15  ;;  %23 = sbr.rel (!%p21_p0) target bundleno = 7 (0x7), region = 105 }
 0x6c9   :  { %2078 = vsyncpa [#allocation7], 1 }
 0x6ca   :  { %2080 = vsyncpa [#allocation7 + $0x1], 1 }
 0x6cb   :  { %2081 = vsyncpa [#allocation10], 1 }
 0x6cc   :  { %2082 = vsyncpa [#allocation13], 1 }
 0x6cd   :  { %2083 = vsyncpa [#allocation8], 1 }
 0x6ce   :  { %2085 = vsyncpa [#allocation8 + $0x1], 1 }

</bundles_post_ra>
